<compile_context>
chip_gen: v7x
topology: tpu7x:2x2x1
jax: 0.10.0
libtpu: 0.0.40
codegen_flags: <defaults>
</compile_context>

<pallas_src>
import functools

import jax
import jax.numpy as jnp
from jax.experimental import pallas as pl
from jax.experimental.pallas import tpu as pltpu


# ---------------------------------------------------------------------------
# Fused multi-stage kernel: one batch element per grid step, all stages inside.
# ---------------------------------------------------------------------------
def _mstcn_kernel(*refs, num_layers, num_stages, causal, pad):
    nw = 8
    x_ref = refs[0]
    stage1 = refs[1:1 + nw]
    idx = 1 + nw
    if num_stages > 1:
        rest = refs[idx:idx + nw]
        idx += nw
    else:
        rest = None
    o_ref = refs[idx]
    pad_ref = refs[idx + 1]                 # (F, T + 2*pad) VMEM scratch

    T = x_ref.shape[2]

    # Zero once per grid step; only the center [pad, pad+T) is ever rewritten,
    # so the halo columns stay zero (this gives the conv's zero padding).
    pad_ref[...] = jnp.zeros_like(pad_ref)

    def softmax_c(z):                       # softmax over channel (sublane) axis
        z = z - jnp.max(z, axis=0, keepdims=True)
        e = jnp.exp(z)
        s = jnp.sum(e, axis=0, keepdims=True)
        inv = pl.reciprocal(s, approx=True)
        inv = inv * (2.0 - s * inv)         # one Newton step -> ~f32-exact
        return e * inv

    def run_stage(h_in, w_in, b_in, w_dil, b_dil, w_res, b_res, w_out, b_out):
        # h_in: (C_in, T); weights are (C_out, C_in) -> left-multiply matmuls.
        h = jnp.dot(w_in, h_in, preferred_element_type=jnp.float32) + b_in
        for i in range(num_layers):         # static unroll over layers
            d = 2 ** i
            offs = (-2 * d, -d, 0) if causal else (-d, 0, d)
            # write current activation into the zero-padded scratch center
            pad_ref[:, pad:pad + T] = h
            # three time-shifted taps via static slices, stacked to (3F, T)
            taps = jnp.concatenate(
                [pad_ref[:, pad + off:pad + off + T] for off in offs], axis=0)
            out = jnp.dot(w_dil[i], taps,
                          preferred_element_type=jnp.float32) + b_dil[i]
            out = jnp.maximum(out, 0.0)                          # ReLU
            out = jnp.dot(w_res[i], out,
                          preferred_element_type=jnp.float32) + b_res[i]
            # TODO(synk): nn.Dropout() is identity in eval mode; no train RNG.
            h = h + out                                          # residual
        return jnp.dot(w_out, h, preferred_element_type=jnp.float32) + b_out

    # stage 1 (no softmax on input)
    w1 = tuple(r[...] for r in stage1)
    out = run_stage(x_ref[0], *w1)          # (C, T)
    o_ref[0, 0] = out
    # stages 2..S (softmax over classes on input)
    for s in range(1, num_stages):
        ws = tuple(r[s - 1] for r in rest)
        out = run_stage(softmax_c(out), *ws)
        o_ref[s, 0] = out


# ---------------------------------------------------------------------------
# Wrapper
# ---------------------------------------------------------------------------
def multistage_forward(x_nct, params_list, *, causal=False):
    """MultiStageModel.forward.  x_nct: (N, dim, T) like PyTorch NCT.

    Returns (num_stages, N, num_classes, T), matching the PyTorch output."""
    N, D, T = x_nct.shape
    S = len(params_list)
    L = params_list[0]['w_dil'].shape[0]
    F = params_list[0]['w_dil'].shape[2]
    C = params_list[0]['w_out'].shape[0]
    pad = (2 ** (L - 1)) * (2 if causal else 1)

    def prep(p):
        return dict(
            w_in=p['w_in'],                                           # (F, Cin)
            b_in=p['b_in'].reshape(-1, 1),                            # (F, 1)
            # (L, 3, F, F) tap-major -> (L, F, 3F) fused-tap weight
            w_dil=jnp.transpose(p['w_dil'], (0, 2, 1, 3)).reshape(L, F, 3 * F),
            b_dil=p['b_dil'].reshape(L, F, 1),
            w_res=p['w_res'],                                         # (L, F, F)
            b_res=p['b_res'].reshape(L, F, 1),
            w_out=p['w_out'],                                         # (C, F)
            b_out=p['b_out'].reshape(-1, 1),                          # (C, 1)
        )

    p1 = prep(params_list[0])
    args = [x_nct,
            p1['w_in'], p1['b_in'], p1['w_dil'], p1['b_dil'],
            p1['w_res'], p1['b_res'], p1['w_out'], p1['b_out']]
    in_specs = [
        pl.BlockSpec((1, D, T), lambda b: (b, 0, 0)),             # x (NCT)
        pl.BlockSpec((F, D), lambda b: (0, 0)),                   # w_in
        pl.BlockSpec((F, 1), lambda b: (0, 0)),                   # b_in
        pl.BlockSpec((L, F, 3 * F), lambda b: (0, 0, 0)),         # w_dil fused
        pl.BlockSpec((L, F, 1), lambda b: (0, 0, 0)),             # b_dil
        pl.BlockSpec((L, F, F), lambda b: (0, 0, 0)),             # w_res
        pl.BlockSpec((L, F, 1), lambda b: (0, 0, 0)),             # b_res
        pl.BlockSpec((C, F), lambda b: (0, 0)),                   # w_out
        pl.BlockSpec((C, 1), lambda b: (0, 0)),                   # b_out
    ]
    if S > 1:
        rest = [prep(p) for p in params_list[1:]]
        stack = lambda k: jnp.stack([r[k] for r in rest], axis=0)
        args += [stack('w_in'), stack('b_in'), stack('w_dil'), stack('b_dil'),
                 stack('w_res'), stack('b_res'), stack('w_out'), stack('b_out')]
        R = S - 1
        in_specs += [
            pl.BlockSpec((R, F, C), lambda b: (0, 0, 0)),
            pl.BlockSpec((R, F, 1), lambda b: (0, 0, 0)),
            pl.BlockSpec((R, L, F, 3 * F), lambda b: (0, 0, 0, 0)),
            pl.BlockSpec((R, L, F, 1), lambda b: (0, 0, 0, 0)),
            pl.BlockSpec((R, L, F, F), lambda b: (0, 0, 0, 0)),
            pl.BlockSpec((R, L, F, 1), lambda b: (0, 0, 0, 0)),
            pl.BlockSpec((R, C, F), lambda b: (0, 0, 0)),
            pl.BlockSpec((R, C, 1), lambda b: (0, 0, 0)),
        ]

    kernel = functools.partial(_mstcn_kernel, num_layers=L, num_stages=S,
                               causal=causal, pad=pad)

    return pl.pallas_call(
        kernel,
        out_shape=jax.ShapeDtypeStruct((S, N, C, T), jnp.float32),
        grid=(N,),
        in_specs=in_specs,
        out_specs=pl.BlockSpec((S, 1, C, T), lambda b: (0, b, 0, 0)),
        scratch_shapes=[pltpu.VMEM((F, T + 2 * pad), jnp.float32)],
        compiler_params=pltpu.CompilerParams(
            dimension_semantics=("parallel",)),
    )(*args)


# ---------------------------------------------------------------------------
# Pure-JAX reference (NCT layout, independent shift implementation)
# ---------------------------------------------------------------------------
def _conv1x1_nct(x, w, b):                       # w (O, I), b (O,)
    return jnp.einsum('oi,nit->not', w, x) + b[None, :, None]


def _shift_t(x, off):
    # x: (N, C, T); y[..., t] = x[..., t+off], zero padded at boundaries.
    T = x.shape[-1]
    if off == 0:
        return x
    if off > 0:
        return jnp.pad(x[..., off:], ((0, 0), (0, 0), (0, off)))
    return jnp.pad(x[..., :T + off], ((0, 0), (0, 0), (-off, 0)))


def _stage_ref(x, p, apply_softmax, causal):
    if apply_softmax:
        x = jax.nn.softmax(x, axis=1)
    h = _conv1x1_nct(x, p['w_in'], p['b_in'])
    L = p['w_dil'].shape[0]
    for i in range(L):
        d = 2 ** i
        offs = (-2 * d, -d, 0) if causal else (-d, 0, d)
        acc = jnp.zeros_like(h) + p['b_dil'][i][None, :, None]
        for k, off in enumerate(offs):
            acc = acc + jnp.einsum('oi,nit->not', p['w_dil'][i, k],
                                   _shift_t(h, off))
        out = jnp.maximum(acc, 0.0)
        out = _conv1x1_nct(out, p['w_res'][i], p['b_res'][i])
        h = h + out
    return _conv1x1_nct(h, p['w_out'], p['b_out'])


def multistage_ref(x_nct, params_list, *, causal=False):
    outs = []
    h = _stage_ref(x_nct, params_list[0], False, causal)
    outs.append(h)
    for p in params_list[1:]:
        h = _stage_ref(h, p, True, causal)
        outs.append(h)
    return jnp.stack(outs, axis=0)


# ---------------------------------------------------------------------------
# Deterministic synthetic parameter init (shapes follow the nn.Module __init__;
# all weights stored (C_out, C_in), dilated conv stored (layer, tap, out, in)).
# ---------------------------------------------------------------------------
def init_stage_params(key, num_layers, num_f_maps, dim, num_classes):
    ks = jax.random.split(key, 8)

    def u(k, shape, fan_in):
        bound = 1.0 / (fan_in ** 0.5)
        return jax.random.uniform(k, shape, jnp.float32, -bound, bound)

    F, D, C, L = num_f_maps, dim, num_classes, num_layers
    return {
        'w_in':  u(ks[0], (F, D), D),            # Conv1d(dim, F, 1)
        'b_in':  u(ks[1], (F,), D),
        'w_dil': u(ks[2], (L, 3, F, F), 3 * F),  # Conv1d(F, F, 3, dilation=2^i)
        'b_dil': u(ks[3], (L, F), 3 * F),
        'w_res': u(ks[4], (L, F, F), F),         # Conv1d(F, F, 1)
        'b_res': u(ks[5], (L, F), F),
        'w_out': u(ks[6], (C, F), F),            # Conv1d(F, num_classes, 1)
        'b_out': u(ks[7], (C,), F),
    }


if __name__ == "__main__":
    # MultiStageModel(num_stages=3, num_layers=4, num_f_maps=8, dim=12,
    #                 num_classes=6, causal_conv=False)
    num_stages, num_layers, num_f_maps, dim, num_classes = 3, 4, 8, 12, 6
    causal_conv = False
    N, T = 2, 16

    key = jax.random.PRNGKey(0)
    kx, kp = jax.random.split(key)
    x = jax.random.normal(kx, (N, dim, T), jnp.float32)     # PyTorch (N, C, T)

    pkeys = jax.random.split(kp, num_stages)
    params = [init_stage_params(pkeys[0], num_layers, num_f_maps, dim,
                                num_classes)]
    for s in range(1, num_stages):
        params.append(init_stage_params(pkeys[s], num_layers, num_f_maps,
                                        num_classes, num_classes))

    out = multistage_forward(x, params, causal=causal_conv)
    out = jax.block_until_ready(out)
    assert out.shape == (num_stages, N, num_classes, T), out.shape

    ref = multistage_ref(x, params, causal=causal_conv)
    err = float(jnp.max(jnp.abs(out - ref)))
    assert err < 1e-3, f"max abs error vs reference: {err}"

    print("KERNEL_OK")
</pallas_src>

<mosaic_0001>
module attributes {stable_mosaic.version = 11 : i64} {
  func.func @_mstcn_kernel(%arg0: i32, %arg1: memref<1x12x16xf32, #tpu.memory_space<vmem>>, %arg2: memref<8x12xf32, #tpu.memory_space<vmem>>, %arg3: memref<8x1xf32, #tpu.memory_space<vmem>>, %arg4: memref<4x8x24xf32, #tpu.memory_space<vmem>>, %arg5: memref<4x8x1xf32, #tpu.memory_space<vmem>>, %arg6: memref<4x8x8xf32, #tpu.memory_space<vmem>>, %arg7: memref<4x8x1xf32, #tpu.memory_space<vmem>>, %arg8: memref<6x8xf32, #tpu.memory_space<vmem>>, %arg9: memref<6x1xf32, #tpu.memory_space<vmem>>, %arg10: memref<2x8x6xf32, #tpu.memory_space<vmem>>, %arg11: memref<2x8x1xf32, #tpu.memory_space<vmem>>, %arg12: memref<2x4x8x24xf32, #tpu.memory_space<vmem>>, %arg13: memref<2x4x8x1xf32, #tpu.memory_space<vmem>>, %arg14: memref<2x4x8x8xf32, #tpu.memory_space<vmem>>, %arg15: memref<2x4x8x1xf32, #tpu.memory_space<vmem>>, %arg16: memref<2x6x8xf32, #tpu.memory_space<vmem>>, %arg17: memref<2x6x1xf32, #tpu.memory_space<vmem>>, %arg18: memref<3x1x6x16xf32, #tpu.memory_space<vmem>>, %arg19: memref<8x32xf32, #tpu.memory_space<vmem>>) attributes {dimension_semantics = [#tpu.dimension_semantics<parallel>], iteration_bounds = array<i64: 2>, scalar_prefetch = 0 : i64, scratch_operands = 1 : i64, tpu.core_type = #tpu.core_type<tc>, window_params = [{transform_indices = @transform_0, window_bounds = array<i64: 1, 12, 16>}, {pipeline_mode = #tpu.pipeline_mode<synchronous>, transform_indices = @transform_1, window_bounds = array<i64: 8, 12>}, {pipeline_mode = #tpu.pipeline_mode<synchronous>, transform_indices = @transform_2, window_bounds = array<i64: 8, 1>}, {pipeline_mode = #tpu.pipeline_mode<synchronous>, transform_indices = @transform_3, window_bounds = array<i64: 4, 8, 24>}, {pipeline_mode = #tpu.pipeline_mode<synchronous>, transform_indices = @transform_4, window_bounds = array<i64: 4, 8, 1>}, {pipeline_mode = #tpu.pipeline_mode<synchronous>, transform_indices = @transform_5, window_bounds = array<i64: 4, 8, 8>}, {pipeline_mode = #tpu.pipeline_mode<synchronous>, transform_indices = @transform_6, window_bounds = array<i64: 4, 8, 1>}, {pipeline_mode = #tpu.pipeline_mode<synchronous>, transform_indices = @transform_7, window_bounds = array<i64: 6, 8>}, {pipeline_mode = #tpu.pipeline_mode<synchronous>, transform_indices = @transform_8, window_bounds = array<i64: 6, 1>}, {pipeline_mode = #tpu.pipeline_mode<synchronous>, transform_indices = @transform_9, window_bounds = array<i64: 2, 8, 6>}, {pipeline_mode = #tpu.pipeline_mode<synchronous>, transform_indices = @transform_10, window_bounds = array<i64: 2, 8, 1>}, {pipeline_mode = #tpu.pipeline_mode<synchronous>, transform_indices = @transform_11, window_bounds = array<i64: 2, 4, 8, 24>}, {pipeline_mode = #tpu.pipeline_mode<synchronous>, transform_indices = @transform_12, window_bounds = array<i64: 2, 4, 8, 1>}, {pipeline_mode = #tpu.pipeline_mode<synchronous>, transform_indices = @transform_13, window_bounds = array<i64: 2, 4, 8, 8>}, {pipeline_mode = #tpu.pipeline_mode<synchronous>, transform_indices = @transform_14, window_bounds = array<i64: 2, 4, 8, 1>}, {pipeline_mode = #tpu.pipeline_mode<synchronous>, transform_indices = @transform_15, window_bounds = array<i64: 2, 6, 8>}, {pipeline_mode = #tpu.pipeline_mode<synchronous>, transform_indices = @transform_16, window_bounds = array<i64: 2, 6, 1>}, {transform_indices = @transform_17, window_bounds = array<i64: 3, 1, 6, 16>}]} {
    %cst = arith.constant 0.000000e+00 : f32
    %0 = vector.broadcast %cst : f32 to vector<8x32xf32>
    %c0 = arith.constant 0 : index
    %c0_0 = arith.constant 0 : index
    %1 = vector.load %arg19[%c0, %c0_0] : memref<8x32xf32, #tpu.memory_space<vmem>>, vector<8x32xf32>
    tpu.vector_store %arg19[%c0, %c0_0], %0 {strides = array<i32>} : memref<8x32xf32, #tpu.memory_space<vmem>>, vector<8x32xf32>,
    %c0_1 = arith.constant 0 : index
    %c0_2 = arith.constant 0 : index
    %2 = vector.load %arg2[%c0_1, %c0_2] : memref<8x12xf32, #tpu.memory_space<vmem>>, vector<8x12xf32>
    %c0_3 = arith.constant 0 : index
    %c0_4 = arith.constant 0 : index
    %3 = vector.load %arg3[%c0_3, %c0_4] : memref<8x1xf32, #tpu.memory_space<vmem>>, vector<8x1xf32>
    %c0_5 = arith.constant 0 : index
    %c0_6 = arith.constant 0 : index
    %c0_7 = arith.constant 0 : index
    %4 = vector.load %arg4[%c0_5, %c0_6, %c0_7] : memref<4x8x24xf32, #tpu.memory_space<vmem>>, vector<4x8x24xf32>
    %c0_8 = arith.constant 0 : index
    %c0_9 = arith.constant 0 : index
    %c0_10 = arith.constant 0 : index
    %5 = vector.load %arg5[%c0_8, %c0_9, %c0_10] : memref<4x8x1xf32, #tpu.memory_space<vmem>>, vector<4x8x1xf32>
    %c0_11 = arith.constant 0 : index
    %c0_12 = arith.constant 0 : index
    %c0_13 = arith.constant 0 : index
    %6 = vector.load %arg6[%c0_11, %c0_12, %c0_13] : memref<4x8x8xf32, #tpu.memory_space<vmem>>, vector<4x8x8xf32>
    %c0_14 = arith.constant 0 : index
    %c0_15 = arith.constant 0 : index
    %c0_16 = arith.constant 0 : index
    %7 = vector.load %arg7[%c0_14, %c0_15, %c0_16] : memref<4x8x1xf32, #tpu.memory_space<vmem>>, vector<4x8x1xf32>
    %c0_17 = arith.constant 0 : index
    %c0_18 = arith.constant 0 : index
    %8 = vector.load %arg8[%c0_17, %c0_18] : memref<6x8xf32, #tpu.memory_space<vmem>>, vector<6x8xf32>
    %c0_19 = arith.constant 0 : index
    %c0_20 = arith.constant 0 : index
    %9 = vector.load %arg9[%c0_19, %c0_20] : memref<6x1xf32, #tpu.memory_space<vmem>>, vector<6x1xf32>
    %c0_21 = arith.constant 0 : index
    %c0_22 = arith.constant 0 : index
    %c0_23 = arith.constant 0 : index
    %10 = vector.load %arg1[%c0_21, %c0_22, %c0_23] : memref<1x12x16xf32, #tpu.memory_space<vmem>>, vector<1x12x16xf32>
    %11 = vector.shape_cast %10 : vector<1x12x16xf32> to vector<12x16xf32>
    %cst_24 = arith.constant dense<0.000000e+00> : vector<8x16xf32>
    %12 = tpu.matmul %2, %11, %cst_24 {dimension_numbers = #tpu.dot_dimension_numbers<[1], [0], [0], [1], [0, 0, 1, 1], [], []>} : vector<8x12xf32>, vector<12x16xf32>, vector<8x16xf32> -> vector<8x16xf32>
    %13 = vector.broadcast %3 : vector<8x1xf32> to vector<8x16xf32>
    %14 = arith.addf %12, %13 : vector<8x16xf32>
    %c0_25 = arith.constant 0 : index
    %c8 = arith.constant 8 : index
    %15 = vector.load %arg19[%c0_25, %c8] : memref<8x32xf32, #tpu.memory_space<vmem>>, vector<8x16xf32>
    tpu.vector_store %arg19[%c0_25, %c8], %14 {strides = array<i32>} : memref<8x32xf32, #tpu.memory_space<vmem>>, vector<8x16xf32>,
    %c0_26 = arith.constant 0 : index
    %c7 = arith.constant 7 : index
    %16 = vector.load %arg19[%c0_26, %c7] : memref<8x32xf32, #tpu.memory_space<vmem>>, vector<8x16xf32>
    %c0_27 = arith.constant 0 : index
    %c8_28 = arith.constant 8 : index
    %17 = vector.load %arg19[%c0_27, %c8_28] : memref<8x32xf32, #tpu.memory_space<vmem>>, vector<8x16xf32>
    %c0_29 = arith.constant 0 : index
    %c9 = arith.constant 9 : index
    %18 = vector.load %arg19[%c0_29, %c9] : memref<8x32xf32, #tpu.memory_space<vmem>>, vector<8x16xf32>
    %19 = tpu.concatenate %16, %17, %18 in 0 : vector<8x16xf32>, vector<8x16xf32>, vector<8x16xf32> -> vector<24x16xf32>
    %20 = vector.extract_strided_slice %4 {offsets = [0, 0, 0], sizes = [1, 8, 24], strides = [1, 1, 1]} : vector<4x8x24xf32> to vector<1x8x24xf32>
    %21 = vector.shape_cast %20 : vector<1x8x24xf32> to vector<8x24xf32>
    %cst_30 = arith.constant dense<0.000000e+00> : vector<8x16xf32>
    %22 = tpu.matmul %21, %19, %cst_30 {dimension_numbers = #tpu.dot_dimension_numbers<[1], [0], [0], [1], [0, 0, 1, 1], [], []>} : vector<8x24xf32>, vector<24x16xf32>, vector<8x16xf32> -> vector<8x16xf32>
    %23 = vector.extract_strided_slice %5 {offsets = [0, 0, 0], sizes = [1, 8, 1], strides = [1, 1, 1]} : vector<4x8x1xf32> to vector<1x8x1xf32>
    %24 = vector.shape_cast %23 : vector<1x8x1xf32> to vector<8x1xf32>
    %25 = vector.broadcast %24 : vector<8x1xf32> to vector<8x16xf32>
    %26 = arith.addf %22, %25 : vector<8x16xf32>
    %cst_31 = arith.constant 0.000000e+00 : f32
    %27 = vector.broadcast %cst_31 : f32 to vector<8x16xf32>
    %28 = arith.maximumf %26, %27 : vector<8x16xf32>
    %29 = vector.extract_strided_slice %6 {offsets = [0, 0, 0], sizes = [1, 8, 8], strides = [1, 1, 1]} : vector<4x8x8xf32> to vector<1x8x8xf32>
    %30 = vector.shape_cast %29 : vector<1x8x8xf32> to vector<8x8xf32>
    %cst_32 = arith.constant dense<0.000000e+00> : vector<8x16xf32>
    %31 = tpu.matmul %30, %28, %cst_32 {dimension_numbers = #tpu.dot_dimension_numbers<[1], [0], [0], [1], [0, 0, 1, 1], [], []>} : vector<8x8xf32>, vector<8x16xf32>, vector<8x16xf32> -> vector<8x16xf32>
    %32 = vector.extract_strided_slice %7 {offsets = [0, 0, 0], sizes = [1, 8, 1], strides = [1, 1, 1]} : vector<4x8x1xf32> to vector<1x8x1xf32>
    %33 = vector.shape_cast %32 : vector<1x8x1xf32> to vector<8x1xf32>
    %34 = vector.broadcast %33 : vector<8x1xf32> to vector<8x16xf32>
    %35 = arith.addf %31, %34 : vector<8x16xf32>
    %36 = arith.addf %14, %35 : vector<8x16xf32>
    %c0_33 = arith.constant 0 : index
    %c8_34 = arith.constant 8 : index
    %37 = vector.load %arg19[%c0_33, %c8_34] : memref<8x32xf32, #tpu.memory_space<vmem>>, vector<8x16xf32>
    tpu.vector_store %arg19[%c0_33, %c8_34], %36 {strides = array<i32>} : memref<8x32xf32, #tpu.memory_space<vmem>>, vector<8x16xf32>,
    %c0_35 = arith.constant 0 : index
    %c6 = arith.constant 6 : index
    %38 = vector.load %arg19[%c0_35, %c6] : memref<8x32xf32, #tpu.memory_space<vmem>>, vector<8x16xf32>
    %c0_36 = arith.constant 0 : index
    %c8_37 = arith.constant 8 : index
    %39 = vector.load %arg19[%c0_36, %c8_37] : memref<8x32xf32, #tpu.memory_space<vmem>>, vector<8x16xf32>
    %c0_38 = arith.constant 0 : index
    %c10 = arith.constant 10 : index
    %40 = vector.load %arg19[%c0_38, %c10] : memref<8x32xf32, #tpu.memory_space<vmem>>, vector<8x16xf32>
    %41 = tpu.concatenate %38, %39, %40 in 0 : vector<8x16xf32>, vector<8x16xf32>, vector<8x16xf32> -> vector<24x16xf32>
    %42 = vector.extract_strided_slice %4 {offsets = [1, 0, 0], sizes = [1, 8, 24], strides = [1, 1, 1]} : vector<4x8x24xf32> to vector<1x8x24xf32>
    %43 = vector.shape_cast %42 : vector<1x8x24xf32> to vector<8x24xf32>
    %cst_39 = arith.constant dense<0.000000e+00> : vector<8x16xf32>
    %44 = tpu.matmul %43, %41, %cst_39 {dimension_numbers = #tpu.dot_dimension_numbers<[1], [0], [0], [1], [0, 0, 1, 1], [], []>} : vector<8x24xf32>, vector<24x16xf32>, vector<8x16xf32> -> vector<8x16xf32>
    %45 = vector.extract_strided_slice %5 {offsets = [1, 0, 0], sizes = [1, 8, 1], strides = [1, 1, 1]} : vector<4x8x1xf32> to vector<1x8x1xf32>
    %46 = vector.shape_cast %45 : vector<1x8x1xf32> to vector<8x1xf32>
    %47 = vector.broadcast %46 : vector<8x1xf32> to vector<8x16xf32>
    %48 = arith.addf %44, %47 : vector<8x16xf32>
    %cst_40 = arith.constant 0.000000e+00 : f32
    %49 = vector.broadcast %cst_40 : f32 to vector<8x16xf32>
    %50 = arith.maximumf %48, %49 : vector<8x16xf32>
    %51 = vector.extract_strided_slice %6 {offsets = [1, 0, 0], sizes = [1, 8, 8], strides = [1, 1, 1]} : vector<4x8x8xf32> to vector<1x8x8xf32>
    %52 = vector.shape_cast %51 : vector<1x8x8xf32> to vector<8x8xf32>
    %cst_41 = arith.constant dense<0.000000e+00> : vector<8x16xf32>
    %53 = tpu.matmul %52, %50, %cst_41 {dimension_numbers = #tpu.dot_dimension_numbers<[1], [0], [0], [1], [0, 0, 1, 1], [], []>} : vector<8x8xf32>, vector<8x16xf32>, vector<8x16xf32> -> vector<8x16xf32>
    %54 = vector.extract_strided_slice %7 {offsets = [1, 0, 0], sizes = [1, 8, 1], strides = [1, 1, 1]} : vector<4x8x1xf32> to vector<1x8x1xf32>
    %55 = vector.shape_cast %54 : vector<1x8x1xf32> to vector<8x1xf32>
    %56 = vector.broadcast %55 : vector<8x1xf32> to vector<8x16xf32>
    %57 = arith.addf %53, %56 : vector<8x16xf32>
    %58 = arith.addf %36, %57 : vector<8x16xf32>
    %c0_42 = arith.constant 0 : index
    %c8_43 = arith.constant 8 : index
    %59 = vector.load %arg19[%c0_42, %c8_43] : memref<8x32xf32, #tpu.memory_space<vmem>>, vector<8x16xf32>
    tpu.vector_store %arg19[%c0_42, %c8_43], %58 {strides = array<i32>} : memref<8x32xf32, #tpu.memory_space<vmem>>, vector<8x16xf32>,
    %c0_44 = arith.constant 0 : index
    %c4 = arith.constant 4 : index
    %60 = vector.load %arg19[%c0_44, %c4] : memref<8x32xf32, #tpu.memory_space<vmem>>, vector<8x16xf32>
    %c0_45 = arith.constant 0 : index
    %c8_46 = arith.constant 8 : index
    %61 = vector.load %arg19[%c0_45, %c8_46] : memref<8x32xf32, #tpu.memory_space<vmem>>, vector<8x16xf32>
    %c0_47 = arith.constant 0 : index
    %c12 = arith.constant 12 : index
    %62 = vector.load %arg19[%c0_47, %c12] : memref<8x32xf32, #tpu.memory_space<vmem>>, vector<8x16xf32>
    %63 = tpu.concatenate %60, %61, %62 in 0 : vector<8x16xf32>, vector<8x16xf32>, vector<8x16xf32> -> vector<24x16xf32>
    %64 = vector.extract_strided_slice %4 {offsets = [2, 0, 0], sizes = [1, 8, 24], strides = [1, 1, 1]} : vector<4x8x24xf32> to vector<1x8x24xf32>
    %65 = vector.shape_cast %64 : vector<1x8x24xf32> to vector<8x24xf32>
    %cst_48 = arith.constant dense<0.000000e+00> : vector<8x16xf32>
    %66 = tpu.matmul %65, %63, %cst_48 {dimension_numbers = #tpu.dot_dimension_numbers<[1], [0], [0], [1], [0, 0, 1, 1], [], []>} : vector<8x24xf32>, vector<24x16xf32>, vector<8x16xf32> -> vector<8x16xf32>
    %67 = vector.extract_strided_slice %5 {offsets = [2, 0, 0], sizes = [1, 8, 1], strides = [1, 1, 1]} : vector<4x8x1xf32> to vector<1x8x1xf32>
    %68 = vector.shape_cast %67 : vector<1x8x1xf32> to vector<8x1xf32>
    %69 = vector.broadcast %68 : vector<8x1xf32> to vector<8x16xf32>
    %70 = arith.addf %66, %69 : vector<8x16xf32>
    %cst_49 = arith.constant 0.000000e+00 : f32
    %71 = vector.broadcast %cst_49 : f32 to vector<8x16xf32>
    %72 = arith.maximumf %70, %71 : vector<8x16xf32>
    %73 = vector.extract_strided_slice %6 {offsets = [2, 0, 0], sizes = [1, 8, 8], strides = [1, 1, 1]} : vector<4x8x8xf32> to vector<1x8x8xf32>
    %74 = vector.shape_cast %73 : vector<1x8x8xf32> to vector<8x8xf32>
    %cst_50 = arith.constant dense<0.000000e+00> : vector<8x16xf32>
    %75 = tpu.matmul %74, %72, %cst_50 {dimension_numbers = #tpu.dot_dimension_numbers<[1], [0], [0], [1], [0, 0, 1, 1], [], []>} : vector<8x8xf32>, vector<8x16xf32>, vector<8x16xf32> -> vector<8x16xf32>
    %76 = vector.extract_strided_slice %7 {offsets = [2, 0, 0], sizes = [1, 8, 1], strides = [1, 1, 1]} : vector<4x8x1xf32> to vector<1x8x1xf32>
    %77 = vector.shape_cast %76 : vector<1x8x1xf32> to vector<8x1xf32>
    %78 = vector.broadcast %77 : vector<8x1xf32> to vector<8x16xf32>
    %79 = arith.addf %75, %78 : vector<8x16xf32>
    %80 = arith.addf %58, %79 : vector<8x16xf32>
    %c0_51 = arith.constant 0 : index
    %c8_52 = arith.constant 8 : index
    %81 = vector.load %arg19[%c0_51, %c8_52] : memref<8x32xf32, #tpu.memory_space<vmem>>, vector<8x16xf32>
    tpu.vector_store %arg19[%c0_51, %c8_52], %80 {strides = array<i32>} : memref<8x32xf32, #tpu.memory_space<vmem>>, vector<8x16xf32>,
    %c0_53 = arith.constant 0 : index
    %c0_54 = arith.constant 0 : index
    %82 = vector.load %arg19[%c0_53, %c0_54] : memref<8x32xf32, #tpu.memory_space<vmem>>, vector<8x16xf32>
    %c0_55 = arith.constant 0 : index
    %c8_56 = arith.constant 8 : index
    %83 = vector.load %arg19[%c0_55, %c8_56] : memref<8x32xf32, #tpu.memory_space<vmem>>, vector<8x16xf32>
    %c0_57 = arith.constant 0 : index
    %c16 = arith.constant 16 : index
    %84 = vector.load %arg19[%c0_57, %c16] : memref<8x32xf32, #tpu.memory_space<vmem>>, vector<8x16xf32>
    %85 = tpu.concatenate %82, %83, %84 in 0 : vector<8x16xf32>, vector<8x16xf32>, vector<8x16xf32> -> vector<24x16xf32>
    %86 = vector.extract_strided_slice %4 {offsets = [3, 0, 0], sizes = [1, 8, 24], strides = [1, 1, 1]} : vector<4x8x24xf32> to vector<1x8x24xf32>
    %87 = vector.shape_cast %86 : vector<1x8x24xf32> to vector<8x24xf32>
    %cst_58 = arith.constant dense<0.000000e+00> : vector<8x16xf32>
    %88 = tpu.matmul %87, %85, %cst_58 {dimension_numbers = #tpu.dot_dimension_numbers<[1], [0], [0], [1], [0, 0, 1, 1], [], []>} : vector<8x24xf32>, vector<24x16xf32>, vector<8x16xf32> -> vector<8x16xf32>
    %89 = vector.extract_strided_slice %5 {offsets = [3, 0, 0], sizes = [1, 8, 1], strides = [1, 1, 1]} : vector<4x8x1xf32> to vector<1x8x1xf32>
    %90 = vector.shape_cast %89 : vector<1x8x1xf32> to vector<8x1xf32>
    %91 = vector.broadcast %90 : vector<8x1xf32> to vector<8x16xf32>
    %92 = arith.addf %88, %91 : vector<8x16xf32>
    %cst_59 = arith.constant 0.000000e+00 : f32
    %93 = vector.broadcast %cst_59 : f32 to vector<8x16xf32>
    %94 = arith.maximumf %92, %93 : vector<8x16xf32>
    %95 = vector.extract_strided_slice %6 {offsets = [3, 0, 0], sizes = [1, 8, 8], strides = [1, 1, 1]} : vector<4x8x8xf32> to vector<1x8x8xf32>
    %96 = vector.shape_cast %95 : vector<1x8x8xf32> to vector<8x8xf32>
    %cst_60 = arith.constant dense<0.000000e+00> : vector<8x16xf32>
    %97 = tpu.matmul %96, %94, %cst_60 {dimension_numbers = #tpu.dot_dimension_numbers<[1], [0], [0], [1], [0, 0, 1, 1], [], []>} : vector<8x8xf32>, vector<8x16xf32>, vector<8x16xf32> -> vector<8x16xf32>
    %98 = vector.extract_strided_slice %7 {offsets = [3, 0, 0], sizes = [1, 8, 1], strides = [1, 1, 1]} : vector<4x8x1xf32> to vector<1x8x1xf32>
    %99 = vector.shape_cast %98 : vector<1x8x1xf32> to vector<8x1xf32>
    %100 = vector.broadcast %99 : vector<8x1xf32> to vector<8x16xf32>
    %101 = arith.addf %97, %100 : vector<8x16xf32>
    %102 = arith.addf %80, %101 : vector<8x16xf32>
    %cst_61 = arith.constant dense<0.000000e+00> : vector<6x16xf32>
    %103 = tpu.matmul %8, %102, %cst_61 {dimension_numbers = #tpu.dot_dimension_numbers<[1], [0], [0], [1], [0, 0, 1, 1], [], []>} : vector<6x8xf32>, vector<8x16xf32>, vector<6x16xf32> -> vector<6x16xf32>
    %104 = vector.broadcast %9 : vector<6x1xf32> to vector<6x16xf32>
    %105 = arith.addf %103, %104 : vector<6x16xf32>
    %c0_62 = arith.constant 0 : index
    %c0_63 = arith.constant 0 : index
    %c0_64 = arith.constant 0 : index
    %c0_65 = arith.constant 0 : index
    %106 = vector.load %arg18[%c0_62, %c0_63, %c0_64, %c0_65] : memref<3x1x6x16xf32, #tpu.memory_space<vmem>>, vector<1x1x6x16xf32>
    %107 = vector.shape_cast %106 : vector<1x1x6x16xf32> to vector<6x16xf32>
    %108 = vector.shape_cast %105 : vector<6x16xf32> to vector<1x1x6x16xf32>
    tpu.vector_store %arg18[%c0_62, %c0_63, %c0_64, %c0_65], %108 {strides = array<i32>} : memref<3x1x6x16xf32, #tpu.memory_space<vmem>>, vector<1x1x6x16xf32>,
    %c0_66 = arith.constant 0 : index
    %c0_67 = arith.constant 0 : index
    %c0_68 = arith.constant 0 : index
    %109 = vector.load %arg10[%c0_66, %c0_67, %c0_68] : memref<2x8x6xf32, #tpu.memory_space<vmem>>, vector<1x8x6xf32>
    %110 = vector.shape_cast %109 : vector<1x8x6xf32> to vector<8x6xf32>
    %c0_69 = arith.constant 0 : index
    %c0_70 = arith.constant 0 : index
    %c0_71 = arith.constant 0 : index
    %111 = vector.load %arg11[%c0_69, %c0_70, %c0_71] : memref<2x8x1xf32, #tpu.memory_space<vmem>>, vector<1x8x1xf32>
    %112 = vector.shape_cast %111 : vector<1x8x1xf32> to vector<8x1xf32>
    %c0_72 = arith.constant 0 : index
    %c0_73 = arith.constant 0 : index
    %c0_74 = arith.constant 0 : index
    %c0_75 = arith.constant 0 : index
    %113 = vector.load %arg12[%c0_72, %c0_73, %c0_74, %c0_75] : memref<2x4x8x24xf32, #tpu.memory_space<vmem>>, vector<1x4x8x24xf32>
    %114 = vector.shape_cast %113 : vector<1x4x8x24xf32> to vector<4x8x24xf32>
    %c0_76 = arith.constant 0 : index
    %c0_77 = arith.constant 0 : index
    %c0_78 = arith.constant 0 : index
    %c0_79 = arith.constant 0 : index
    %115 = vector.load %arg13[%c0_76, %c0_77, %c0_78, %c0_79] : memref<2x4x8x1xf32, #tpu.memory_space<vmem>>, vector<1x4x8x1xf32>
    %116 = vector.shape_cast %115 : vector<1x4x8x1xf32> to vector<4x8x1xf32>
    %c0_80 = arith.constant 0 : index
    %c0_81 = arith.constant 0 : index
    %c0_82 = arith.constant 0 : index
    %c0_83 = arith.constant 0 : index
    %117 = vector.load %arg14[%c0_80, %c0_81, %c0_82, %c0_83] : memref<2x4x8x8xf32, #tpu.memory_space<vmem>>, vector<1x4x8x8xf32>
    %118 = vector.shape_cast %117 : vector<1x4x8x8xf32> to vector<4x8x8xf32>
    %c0_84 = arith.constant 0 : index
    %c0_85 = arith.constant 0 : index
    %c0_86 = arith.constant 0 : index
    %c0_87 = arith.constant 0 : index
    %119 = vector.load %arg15[%c0_84, %c0_85, %c0_86, %c0_87] : memref<2x4x8x1xf32, #tpu.memory_space<vmem>>, vector<1x4x8x1xf32>
    %120 = vector.shape_cast %119 : vector<1x4x8x1xf32> to vector<4x8x1xf32>
    %c0_88 = arith.constant 0 : index
    %c0_89 = arith.constant 0 : index
    %c0_90 = arith.constant 0 : index
    %121 = vector.load %arg16[%c0_88, %c0_89, %c0_90] : memref<2x6x8xf32, #tpu.memory_space<vmem>>, vector<1x6x8xf32>
    %122 = vector.shape_cast %121 : vector<1x6x8xf32> to vector<6x8xf32>
    %c0_91 = arith.constant 0 : index
    %c0_92 = arith.constant 0 : index
    %c0_93 = arith.constant 0 : index
    %123 = vector.load %arg17[%c0_91, %c0_92, %c0_93] : memref<2x6x1xf32, #tpu.memory_space<vmem>>, vector<1x6x1xf32>
    %124 = vector.shape_cast %123 : vector<1x6x1xf32> to vector<6x1xf32>
    %cst_94 = arith.constant dense<0xFF800000> : vector<16xf32>
    %125 = vector.multi_reduction <maximumf>, %105, %cst_94 [0] : vector<6x16xf32> to vector<16xf32>
    %126 = vector.shape_cast %125 : vector<16xf32> to vector<1x16xf32>
    %127 = vector.broadcast %126 : vector<1x16xf32> to vector<6x16xf32>
    %128 = arith.subf %105, %127 : vector<6x16xf32>
    %129 = math.exp %128 : vector<6x16xf32>
    %cst_95 = arith.constant dense<0.000000e+00> : vector<16xf32>
    %130 = vector.multi_reduction <add>, %129, %cst_95 [0] : vector<6x16xf32> to vector<16xf32>
    %131 = vector.shape_cast %130 : vector<16xf32> to vector<1x16xf32>
    %132 = tpu.reciprocal %131 {approx = true} : vector<1x16xf32> -> vector<1x16xf32>
    %133 = arith.mulf %131, %132 : vector<1x16xf32>
    %cst_96 = arith.constant 2.000000e+00 : f32
    %134 = vector.broadcast %cst_96 : f32 to vector<1x16xf32>
    %135 = arith.subf %134, %133 : vector<1x16xf32>
    %136 = arith.mulf %132, %135 : vector<1x16xf32>
    %137 = vector.broadcast %136 : vector<1x16xf32> to vector<6x16xf32>
    %138 = arith.mulf %129, %137 : vector<6x16xf32>
    %cst_97 = arith.constant dense<0.000000e+00> : vector<8x16xf32>
    %139 = tpu.matmul %110, %138, %cst_97 {dimension_numbers = #tpu.dot_dimension_numbers<[1], [0], [0], [1], [0, 0, 1, 1], [], []>} : vector<8x6xf32>, vector<6x16xf32>, vector<8x16xf32> -> vector<8x16xf32>
    %140 = vector.broadcast %112 : vector<8x1xf32> to vector<8x16xf32>
    %141 = arith.addf %139, %140 : vector<8x16xf32>
    %c0_98 = arith.constant 0 : index
    %c8_99 = arith.constant 8 : index
    %142 = vector.load %arg19[%c0_98, %c8_99] : memref<8x32xf32, #tpu.memory_space<vmem>>, vector<8x16xf32>
    tpu.vector_store %arg19[%c0_98, %c8_99], %141 {strides = array<i32>} : memref<8x32xf32, #tpu.memory_space<vmem>>, vector<8x16xf32>,
    %c0_100 = arith.constant 0 : index
    %c7_101 = arith.constant 7 : index
    %143 = vector.load %arg19[%c0_100, %c7_101] : memref<8x32xf32, #tpu.memory_space<vmem>>, vector<8x16xf32>
    %c0_102 = arith.constant 0 : index
    %c8_103 = arith.constant 8 : index
    %144 = vector.load %arg19[%c0_102, %c8_103] : memref<8x32xf32, #tpu.memory_space<vmem>>, vector<8x16xf32>
    %c0_104 = arith.constant 0 : index
    %c9_105 = arith.constant 9 : index
    %145 = vector.load %arg19[%c0_104, %c9_105] : memref<8x32xf32, #tpu.memory_space<vmem>>, vector<8x16xf32>
    %146 = tpu.concatenate %143, %144, %145 in 0 : vector<8x16xf32>, vector<8x16xf32>, vector<8x16xf32> -> vector<24x16xf32>
    %147 = vector.extract_strided_slice %114 {offsets = [0, 0, 0], sizes = [1, 8, 24], strides = [1, 1, 1]} : vector<4x8x24xf32> to vector<1x8x24xf32>
    %148 = vector.shape_cast %147 : vector<1x8x24xf32> to vector<8x24xf32>
    %cst_106 = arith.constant dense<0.000000e+00> : vector<8x16xf32>
    %149 = tpu.matmul %148, %146, %cst_106 {dimension_numbers = #tpu.dot_dimension_numbers<[1], [0], [0], [1], [0, 0, 1, 1], [], []>} : vector<8x24xf32>, vector<24x16xf32>, vector<8x16xf32> -> vector<8x16xf32>
    %150 = vector.extract_strided_slice %116 {offsets = [0, 0, 0], sizes = [1, 8, 1], strides = [1, 1, 1]} : vector<4x8x1xf32> to vector<1x8x1xf32>
    %151 = vector.shape_cast %150 : vector<1x8x1xf32> to vector<8x1xf32>
    %152 = vector.broadcast %151 : vector<8x1xf32> to vector<8x16xf32>
    %153 = arith.addf %149, %152 : vector<8x16xf32>
    %cst_107 = arith.constant 0.000000e+00 : f32
    %154 = vector.broadcast %cst_107 : f32 to vector<8x16xf32>
    %155 = arith.maximumf %153, %154 : vector<8x16xf32>
    %156 = vector.extract_strided_slice %118 {offsets = [0, 0, 0], sizes = [1, 8, 8], strides = [1, 1, 1]} : vector<4x8x8xf32> to vector<1x8x8xf32>
    %157 = vector.shape_cast %156 : vector<1x8x8xf32> to vector<8x8xf32>
    %cst_108 = arith.constant dense<0.000000e+00> : vector<8x16xf32>
    %158 = tpu.matmul %157, %155, %cst_108 {dimension_numbers = #tpu.dot_dimension_numbers<[1], [0], [0], [1], [0, 0, 1, 1], [], []>} : vector<8x8xf32>, vector<8x16xf32>, vector<8x16xf32> -> vector<8x16xf32>
    %159 = vector.extract_strided_slice %120 {offsets = [0, 0, 0], sizes = [1, 8, 1], strides = [1, 1, 1]} : vector<4x8x1xf32> to vector<1x8x1xf32>
    %160 = vector.shape_cast %159 : vector<1x8x1xf32> to vector<8x1xf32>
    %161 = vector.broadcast %160 : vector<8x1xf32> to vector<8x16xf32>
    %162 = arith.addf %158, %161 : vector<8x16xf32>
    %163 = arith.addf %141, %162 : vector<8x16xf32>
    %c0_109 = arith.constant 0 : index
    %c8_110 = arith.constant 8 : index
    %164 = vector.load %arg19[%c0_109, %c8_110] : memref<8x32xf32, #tpu.memory_space<vmem>>, vector<8x16xf32>
    tpu.vector_store %arg19[%c0_109, %c8_110], %163 {strides = array<i32>} : memref<8x32xf32, #tpu.memory_space<vmem>>, vector<8x16xf32>,
    %c0_111 = arith.constant 0 : index
    %c6_112 = arith.constant 6 : index
    %165 = vector.load %arg19[%c0_111, %c6_112] : memref<8x32xf32, #tpu.memory_space<vmem>>, vector<8x16xf32>
    %c0_113 = arith.constant 0 : index
    %c8_114 = arith.constant 8 : index
    %166 = vector.load %arg19[%c0_113, %c8_114] : memref<8x32xf32, #tpu.memory_space<vmem>>, vector<8x16xf32>
    %c0_115 = arith.constant 0 : index
    %c10_116 = arith.constant 10 : index
    %167 = vector.load %arg19[%c0_115, %c10_116] : memref<8x32xf32, #tpu.memory_space<vmem>>, vector<8x16xf32>
    %168 = tpu.concatenate %165, %166, %167 in 0 : vector<8x16xf32>, vector<8x16xf32>, vector<8x16xf32> -> vector<24x16xf32>
    %169 = vector.extract_strided_slice %114 {offsets = [1, 0, 0], sizes = [1, 8, 24], strides = [1, 1, 1]} : vector<4x8x24xf32> to vector<1x8x24xf32>
    %170 = vector.shape_cast %169 : vector<1x8x24xf32> to vector<8x24xf32>
    %cst_117 = arith.constant dense<0.000000e+00> : vector<8x16xf32>
    %171 = tpu.matmul %170, %168, %cst_117 {dimension_numbers = #tpu.dot_dimension_numbers<[1], [0], [0], [1], [0, 0, 1, 1], [], []>} : vector<8x24xf32>, vector<24x16xf32>, vector<8x16xf32> -> vector<8x16xf32>
    %172 = vector.extract_strided_slice %116 {offsets = [1, 0, 0], sizes = [1, 8, 1], strides = [1, 1, 1]} : vector<4x8x1xf32> to vector<1x8x1xf32>
    %173 = vector.shape_cast %172 : vector<1x8x1xf32> to vector<8x1xf32>
    %174 = vector.broadcast %173 : vector<8x1xf32> to vector<8x16xf32>
    %175 = arith.addf %171, %174 : vector<8x16xf32>
    %cst_118 = arith.constant 0.000000e+00 : f32
    %176 = vector.broadcast %cst_118 : f32 to vector<8x16xf32>
    %177 = arith.maximumf %175, %176 : vector<8x16xf32>
    %178 = vector.extract_strided_slice %118 {offsets = [1, 0, 0], sizes = [1, 8, 8], strides = [1, 1, 1]} : vector<4x8x8xf32> to vector<1x8x8xf32>
    %179 = vector.shape_cast %178 : vector<1x8x8xf32> to vector<8x8xf32>
    %cst_119 = arith.constant dense<0.000000e+00> : vector<8x16xf32>
    %180 = tpu.matmul %179, %177, %cst_119 {dimension_numbers = #tpu.dot_dimension_numbers<[1], [0], [0], [1], [0, 0, 1, 1], [], []>} : vector<8x8xf32>, vector<8x16xf32>, vector<8x16xf32> -> vector<8x16xf32>
    %181 = vector.extract_strided_slice %120 {offsets = [1, 0, 0], sizes = [1, 8, 1], strides = [1, 1, 1]} : vector<4x8x1xf32> to vector<1x8x1xf32>
    %182 = vector.shape_cast %181 : vector<1x8x1xf32> to vector<8x1xf32>
    %183 = vector.broadcast %182 : vector<8x1xf32> to vector<8x16xf32>
    %184 = arith.addf %180, %183 : vector<8x16xf32>
    %185 = arith.addf %163, %184 : vector<8x16xf32>
    %c0_120 = arith.constant 0 : index
    %c8_121 = arith.constant 8 : index
    %186 = vector.load %arg19[%c0_120, %c8_121] : memref<8x32xf32, #tpu.memory_space<vmem>>, vector<8x16xf32>
    tpu.vector_store %arg19[%c0_120, %c8_121], %185 {strides = array<i32>} : memref<8x32xf32, #tpu.memory_space<vmem>>, vector<8x16xf32>,
    %c0_122 = arith.constant 0 : index
    %c4_123 = arith.constant 4 : index
    %187 = vector.load %arg19[%c0_122, %c4_123] : memref<8x32xf32, #tpu.memory_space<vmem>>, vector<8x16xf32>
    %c0_124 = arith.constant 0 : index
    %c8_125 = arith.constant 8 : index
    %188 = vector.load %arg19[%c0_124, %c8_125] : memref<8x32xf32, #tpu.memory_space<vmem>>, vector<8x16xf32>
    %c0_126 = arith.constant 0 : index
    %c12_127 = arith.constant 12 : index
    %189 = vector.load %arg19[%c0_126, %c12_127] : memref<8x32xf32, #tpu.memory_space<vmem>>, vector<8x16xf32>
    %190 = tpu.concatenate %187, %188, %189 in 0 : vector<8x16xf32>, vector<8x16xf32>, vector<8x16xf32> -> vector<24x16xf32>
    %191 = vector.extract_strided_slice %114 {offsets = [2, 0, 0], sizes = [1, 8, 24], strides = [1, 1, 1]} : vector<4x8x24xf32> to vector<1x8x24xf32>
    %192 = vector.shape_cast %191 : vector<1x8x24xf32> to vector<8x24xf32>
    %cst_128 = arith.constant dense<0.000000e+00> : vector<8x16xf32>
    %193 = tpu.matmul %192, %190, %cst_128 {dimension_numbers = #tpu.dot_dimension_numbers<[1], [0], [0], [1], [0, 0, 1, 1], [], []>} : vector<8x24xf32>, vector<24x16xf32>, vector<8x16xf32> -> vector<8x16xf32>
    %194 = vector.extract_strided_slice %116 {offsets = [2, 0, 0], sizes = [1, 8, 1], strides = [1, 1, 1]} : vector<4x8x1xf32> to vector<1x8x1xf32>
    %195 = vector.shape_cast %194 : vector<1x8x1xf32> to vector<8x1xf32>
    %196 = vector.broadcast %195 : vector<8x1xf32> to vector<8x16xf32>
    %197 = arith.addf %193, %196 : vector<8x16xf32>
    %cst_129 = arith.constant 0.000000e+00 : f32
    %198 = vector.broadcast %cst_129 : f32 to vector<8x16xf32>
    %199 = arith.maximumf %197, %198 : vector<8x16xf32>
    %200 = vector.extract_strided_slice %118 {offsets = [2, 0, 0], sizes = [1, 8, 8], strides = [1, 1, 1]} : vector<4x8x8xf32> to vector<1x8x8xf32>
    %201 = vector.shape_cast %200 : vector<1x8x8xf32> to vector<8x8xf32>
    %cst_130 = arith.constant dense<0.000000e+00> : vector<8x16xf32>
    %202 = tpu.matmul %201, %199, %cst_130 {dimension_numbers = #tpu.dot_dimension_numbers<[1], [0], [0], [1], [0, 0, 1, 1], [], []>} : vector<8x8xf32>, vector<8x16xf32>, vector<8x16xf32> -> vector<8x16xf32>
    %203 = vector.extract_strided_slice %120 {offsets = [2, 0, 0], sizes = [1, 8, 1], strides = [1, 1, 1]} : vector<4x8x1xf32> to vector<1x8x1xf32>
    %204 = vector.shape_cast %203 : vector<1x8x1xf32> to vector<8x1xf32>
    %205 = vector.broadcast %204 : vector<8x1xf32> to vector<8x16xf32>
    %206 = arith.addf %202, %205 : vector<8x16xf32>
    %207 = arith.addf %185, %206 : vector<8x16xf32>
    %c0_131 = arith.constant 0 : index
    %c8_132 = arith.constant 8 : index
    %208 = vector.load %arg19[%c0_131, %c8_132] : memref<8x32xf32, #tpu.memory_space<vmem>>, vector<8x16xf32>
    tpu.vector_store %arg19[%c0_131, %c8_132], %207 {strides = array<i32>} : memref<8x32xf32, #tpu.memory_space<vmem>>, vector<8x16xf32>,
    %c0_133 = arith.constant 0 : index
    %c0_134 = arith.constant 0 : index
    %209 = vector.load %arg19[%c0_133, %c0_134] : memref<8x32xf32, #tpu.memory_space<vmem>>, vector<8x16xf32>
    %c0_135 = arith.constant 0 : index
    %c8_136 = arith.constant 8 : index
    %210 = vector.load %arg19[%c0_135, %c8_136] : memref<8x32xf32, #tpu.memory_space<vmem>>, vector<8x16xf32>
    %c0_137 = arith.constant 0 : index
    %c16_138 = arith.constant 16 : index
    %211 = vector.load %arg19[%c0_137, %c16_138] : memref<8x32xf32, #tpu.memory_space<vmem>>, vector<8x16xf32>
    %212 = tpu.concatenate %209, %210, %211 in 0 : vector<8x16xf32>, vector<8x16xf32>, vector<8x16xf32> -> vector<24x16xf32>
    %213 = vector.extract_strided_slice %114 {offsets = [3, 0, 0], sizes = [1, 8, 24], strides = [1, 1, 1]} : vector<4x8x24xf32> to vector<1x8x24xf32>
    %214 = vector.shape_cast %213 : vector<1x8x24xf32> to vector<8x24xf32>
    %cst_139 = arith.constant dense<0.000000e+00> : vector<8x16xf32>
    %215 = tpu.matmul %214, %212, %cst_139 {dimension_numbers = #tpu.dot_dimension_numbers<[1], [0], [0], [1], [0, 0, 1, 1], [], []>} : vector<8x24xf32>, vector<24x16xf32>, vector<8x16xf32> -> vector<8x16xf32>
    %216 = vector.extract_strided_slice %116 {offsets = [3, 0, 0], sizes = [1, 8, 1], strides = [1, 1, 1]} : vector<4x8x1xf32> to vector<1x8x1xf32>
    %217 = vector.shape_cast %216 : vector<1x8x1xf32> to vector<8x1xf32>
    %218 = vector.broadcast %217 : vector<8x1xf32> to vector<8x16xf32>
    %219 = arith.addf %215, %218 : vector<8x16xf32>
    %cst_140 = arith.constant 0.000000e+00 : f32
    %220 = vector.broadcast %cst_140 : f32 to vector<8x16xf32>
    %221 = arith.maximumf %219, %220 : vector<8x16xf32>
    %222 = vector.extract_strided_slice %118 {offsets = [3, 0, 0], sizes = [1, 8, 8], strides = [1, 1, 1]} : vector<4x8x8xf32> to vector<1x8x8xf32>
    %223 = vector.shape_cast %222 : vector<1x8x8xf32> to vector<8x8xf32>
    %cst_141 = arith.constant dense<0.000000e+00> : vector<8x16xf32>
    %224 = tpu.matmul %223, %221, %cst_141 {dimension_numbers = #tpu.dot_dimension_numbers<[1], [0], [0], [1], [0, 0, 1, 1], [], []>} : vector<8x8xf32>, vector<8x16xf32>, vector<8x16xf32> -> vector<8x16xf32>
    %225 = vector.extract_strided_slice %120 {offsets = [3, 0, 0], sizes = [1, 8, 1], strides = [1, 1, 1]} : vector<4x8x1xf32> to vector<1x8x1xf32>
    %226 = vector.shape_cast %225 : vector<1x8x1xf32> to vector<8x1xf32>
    %227 = vector.broadcast %226 : vector<8x1xf32> to vector<8x16xf32>
    %228 = arith.addf %224, %227 : vector<8x16xf32>
    %229 = arith.addf %207, %228 : vector<8x16xf32>
    %cst_142 = arith.constant dense<0.000000e+00> : vector<6x16xf32>
    %230 = tpu.matmul %122, %229, %cst_142 {dimension_numbers = #tpu.dot_dimension_numbers<[1], [0], [0], [1], [0, 0, 1, 1], [], []>} : vector<6x8xf32>, vector<8x16xf32>, vector<6x16xf32> -> vector<6x16xf32>
    %231 = vector.broadcast %124 : vector<6x1xf32> to vector<6x16xf32>
    %232 = arith.addf %230, %231 : vector<6x16xf32>
    %c1 = arith.constant 1 : index
    %c0_143 = arith.constant 0 : index
    %c0_144 = arith.constant 0 : index
    %c0_145 = arith.constant 0 : index
    %233 = vector.load %arg18[%c1, %c0_143, %c0_144, %c0_145] : memref<3x1x6x16xf32, #tpu.memory_space<vmem>>, vector<1x1x6x16xf32>
    %234 = vector.shape_cast %233 : vector<1x1x6x16xf32> to vector<6x16xf32>
    %235 = vector.shape_cast %232 : vector<6x16xf32> to vector<1x1x6x16xf32>
    tpu.vector_store %arg18[%c1, %c0_143, %c0_144, %c0_145], %235 {strides = array<i32>} : memref<3x1x6x16xf32, #tpu.memory_space<vmem>>, vector<1x1x6x16xf32>,
    %c1_146 = arith.constant 1 : index
    %c0_147 = arith.constant 0 : index
    %c0_148 = arith.constant 0 : index
    %236 = vector.load %arg10[%c1_146, %c0_147, %c0_148] : memref<2x8x6xf32, #tpu.memory_space<vmem>>, vector<1x8x6xf32>
    %237 = vector.shape_cast %236 : vector<1x8x6xf32> to vector<8x6xf32>
    %c1_149 = arith.constant 1 : index
    %c0_150 = arith.constant 0 : index
    %c0_151 = arith.constant 0 : index
    %238 = vector.load %arg11[%c1_149, %c0_150, %c0_151] : memref<2x8x1xf32, #tpu.memory_space<vmem>>, vector<1x8x1xf32>
    %239 = vector.shape_cast %238 : vector<1x8x1xf32> to vector<8x1xf32>
    %c1_152 = arith.constant 1 : index
    %c0_153 = arith.constant 0 : index
    %c0_154 = arith.constant 0 : index
    %c0_155 = arith.constant 0 : index
    %240 = vector.load %arg12[%c1_152, %c0_153, %c0_154, %c0_155] : memref<2x4x8x24xf32, #tpu.memory_space<vmem>>, vector<1x4x8x24xf32>
    %241 = vector.shape_cast %240 : vector<1x4x8x24xf32> to vector<4x8x24xf32>
    %c1_156 = arith.constant 1 : index
    %c0_157 = arith.constant 0 : index
    %c0_158 = arith.constant 0 : index
    %c0_159 = arith.constant 0 : index
    %242 = vector.load %arg13[%c1_156, %c0_157, %c0_158, %c0_159] : memref<2x4x8x1xf32, #tpu.memory_space<vmem>>, vector<1x4x8x1xf32>
    %243 = vector.shape_cast %242 : vector<1x4x8x1xf32> to vector<4x8x1xf32>
    %c1_160 = arith.constant 1 : index
    %c0_161 = arith.constant 0 : index
    %c0_162 = arith.constant 0 : index
    %c0_163 = arith.constant 0 : index
    %244 = vector.load %arg14[%c1_160, %c0_161, %c0_162, %c0_163] : memref<2x4x8x8xf32, #tpu.memory_space<vmem>>, vector<1x4x8x8xf32>
    %245 = vector.shape_cast %244 : vector<1x4x8x8xf32> to vector<4x8x8xf32>
    %c1_164 = arith.constant 1 : index
    %c0_165 = arith.constant 0 : index
    %c0_166 = arith.constant 0 : index
    %c0_167 = arith.constant 0 : index
    %246 = vector.load %arg15[%c1_164, %c0_165, %c0_166, %c0_167] : memref<2x4x8x1xf32, #tpu.memory_space<vmem>>, vector<1x4x8x1xf32>
    %247 = vector.shape_cast %246 : vector<1x4x8x1xf32> to vector<4x8x1xf32>
    %c1_168 = arith.constant 1 : index
    %c0_169 = arith.constant 0 : index
    %c0_170 = arith.constant 0 : index
    %248 = vector.load %arg16[%c1_168, %c0_169, %c0_170] : memref<2x6x8xf32, #tpu.memory_space<vmem>>, vector<1x6x8xf32>
    %249 = vector.shape_cast %248 : vector<1x6x8xf32> to vector<6x8xf32>
    %c1_171 = arith.constant 1 : index
    %c0_172 = arith.constant 0 : index
    %c0_173 = arith.constant 0 : index
    %250 = vector.load %arg17[%c1_171, %c0_172, %c0_173] : memref<2x6x1xf32, #tpu.memory_space<vmem>>, vector<1x6x1xf32>
    %251 = vector.shape_cast %250 : vector<1x6x1xf32> to vector<6x1xf32>
    %cst_174 = arith.constant dense<0xFF800000> : vector<16xf32>
    %252 = vector.multi_reduction <maximumf>, %232, %cst_174 [0] : vector<6x16xf32> to vector<16xf32>
    %253 = vector.shape_cast %252 : vector<16xf32> to vector<1x16xf32>
    %254 = vector.broadcast %253 : vector<1x16xf32> to vector<6x16xf32>
    %255 = arith.subf %232, %254 : vector<6x16xf32>
    %256 = math.exp %255 : vector<6x16xf32>
    %cst_175 = arith.constant dense<0.000000e+00> : vector<16xf32>
    %257 = vector.multi_reduction <add>, %256, %cst_175 [0] : vector<6x16xf32> to vector<16xf32>
    %258 = vector.shape_cast %257 : vector<16xf32> to vector<1x16xf32>
    %259 = tpu.reciprocal %258 {approx = true} : vector<1x16xf32> -> vector<1x16xf32>
    %260 = arith.mulf %258, %259 : vector<1x16xf32>
    %cst_176 = arith.constant 2.000000e+00 : f32
    %261 = vector.broadcast %cst_176 : f32 to vector<1x16xf32>
    %262 = arith.subf %261, %260 : vector<1x16xf32>
    %263 = arith.mulf %259, %262 : vector<1x16xf32>
    %264 = vector.broadcast %263 : vector<1x16xf32> to vector<6x16xf32>
    %265 = arith.mulf %256, %264 : vector<6x16xf32>
    %cst_177 = arith.constant dense<0.000000e+00> : vector<8x16xf32>
    %266 = tpu.matmul %237, %265, %cst_177 {dimension_numbers = #tpu.dot_dimension_numbers<[1], [0], [0], [1], [0, 0, 1, 1], [], []>} : vector<8x6xf32>, vector<6x16xf32>, vector<8x16xf32> -> vector<8x16xf32>
    %267 = vector.broadcast %239 : vector<8x1xf32> to vector<8x16xf32>
    %268 = arith.addf %266, %267 : vector<8x16xf32>
    %c0_178 = arith.constant 0 : index
    %c8_179 = arith.constant 8 : index
    %269 = vector.load %arg19[%c0_178, %c8_179] : memref<8x32xf32, #tpu.memory_space<vmem>>, vector<8x16xf32>
    tpu.vector_store %arg19[%c0_178, %c8_179], %268 {strides = array<i32>} : memref<8x32xf32, #tpu.memory_space<vmem>>, vector<8x16xf32>,
    %c0_180 = arith.constant 0 : index
    %c7_181 = arith.constant 7 : index
    %270 = vector.load %arg19[%c0_180, %c7_181] : memref<8x32xf32, #tpu.memory_space<vmem>>, vector<8x16xf32>
    %c0_182 = arith.constant 0 : index
    %c8_183 = arith.constant 8 : index
    %271 = vector.load %arg19[%c0_182, %c8_183] : memref<8x32xf32, #tpu.memory_space<vmem>>, vector<8x16xf32>
    %c0_184 = arith.constant 0 : index
    %c9_185 = arith.constant 9 : index
    %272 = vector.load %arg19[%c0_184, %c9_185] : memref<8x32xf32, #tpu.memory_space<vmem>>, vector<8x16xf32>
    %273 = tpu.concatenate %270, %271, %272 in 0 : vector<8x16xf32>, vector<8x16xf32>, vector<8x16xf32> -> vector<24x16xf32>
    %274 = vector.extract_strided_slice %241 {offsets = [0, 0, 0], sizes = [1, 8, 24], strides = [1, 1, 1]} : vector<4x8x24xf32> to vector<1x8x24xf32>
    %275 = vector.shape_cast %274 : vector<1x8x24xf32> to vector<8x24xf32>
    %cst_186 = arith.constant dense<0.000000e+00> : vector<8x16xf32>
    %276 = tpu.matmul %275, %273, %cst_186 {dimension_numbers = #tpu.dot_dimension_numbers<[1], [0], [0], [1], [0, 0, 1, 1], [], []>} : vector<8x24xf32>, vector<24x16xf32>, vector<8x16xf32> -> vector<8x16xf32>
    %277 = vector.extract_strided_slice %243 {offsets = [0, 0, 0], sizes = [1, 8, 1], strides = [1, 1, 1]} : vector<4x8x1xf32> to vector<1x8x1xf32>
    %278 = vector.shape_cast %277 : vector<1x8x1xf32> to vector<8x1xf32>
    %279 = vector.broadcast %278 : vector<8x1xf32> to vector<8x16xf32>
    %280 = arith.addf %276, %279 : vector<8x16xf32>
    %cst_187 = arith.constant 0.000000e+00 : f32
    %281 = vector.broadcast %cst_187 : f32 to vector<8x16xf32>
    %282 = arith.maximumf %280, %281 : vector<8x16xf32>
    %283 = vector.extract_strided_slice %245 {offsets = [0, 0, 0], sizes = [1, 8, 8], strides = [1, 1, 1]} : vector<4x8x8xf32> to vector<1x8x8xf32>
    %284 = vector.shape_cast %283 : vector<1x8x8xf32> to vector<8x8xf32>
    %cst_188 = arith.constant dense<0.000000e+00> : vector<8x16xf32>
    %285 = tpu.matmul %284, %282, %cst_188 {dimension_numbers = #tpu.dot_dimension_numbers<[1], [0], [0], [1], [0, 0, 1, 1], [], []>} : vector<8x8xf32>, vector<8x16xf32>, vector<8x16xf32> -> vector<8x16xf32>
    %286 = vector.extract_strided_slice %247 {offsets = [0, 0, 0], sizes = [1, 8, 1], strides = [1, 1, 1]} : vector<4x8x1xf32> to vector<1x8x1xf32>
    %287 = vector.shape_cast %286 : vector<1x8x1xf32> to vector<8x1xf32>
    %288 = vector.broadcast %287 : vector<8x1xf32> to vector<8x16xf32>
    %289 = arith.addf %285, %288 : vector<8x16xf32>
    %290 = arith.addf %268, %289 : vector<8x16xf32>
    %c0_189 = arith.constant 0 : index
    %c8_190 = arith.constant 8 : index
    %291 = vector.load %arg19[%c0_189, %c8_190] : memref<8x32xf32, #tpu.memory_space<vmem>>, vector<8x16xf32>
    tpu.vector_store %arg19[%c0_189, %c8_190], %290 {strides = array<i32>} : memref<8x32xf32, #tpu.memory_space<vmem>>, vector<8x16xf32>,
    %c0_191 = arith.constant 0 : index
    %c6_192 = arith.constant 6 : index
    %292 = vector.load %arg19[%c0_191, %c6_192] : memref<8x32xf32, #tpu.memory_space<vmem>>, vector<8x16xf32>
    %c0_193 = arith.constant 0 : index
    %c8_194 = arith.constant 8 : index
    %293 = vector.load %arg19[%c0_193, %c8_194] : memref<8x32xf32, #tpu.memory_space<vmem>>, vector<8x16xf32>
    %c0_195 = arith.constant 0 : index
    %c10_196 = arith.constant 10 : index
    %294 = vector.load %arg19[%c0_195, %c10_196] : memref<8x32xf32, #tpu.memory_space<vmem>>, vector<8x16xf32>
    %295 = tpu.concatenate %292, %293, %294 in 0 : vector<8x16xf32>, vector<8x16xf32>, vector<8x16xf32> -> vector<24x16xf32>
    %296 = vector.extract_strided_slice %241 {offsets = [1, 0, 0], sizes = [1, 8, 24], strides = [1, 1, 1]} : vector<4x8x24xf32> to vector<1x8x24xf32>
    %297 = vector.shape_cast %296 : vector<1x8x24xf32> to vector<8x24xf32>
    %cst_197 = arith.constant dense<0.000000e+00> : vector<8x16xf32>
    %298 = tpu.matmul %297, %295, %cst_197 {dimension_numbers = #tpu.dot_dimension_numbers<[1], [0], [0], [1], [0, 0, 1, 1], [], []>} : vector<8x24xf32>, vector<24x16xf32>, vector<8x16xf32> -> vector<8x16xf32>
    %299 = vector.extract_strided_slice %243 {offsets = [1, 0, 0], sizes = [1, 8, 1], strides = [1, 1, 1]} : vector<4x8x1xf32> to vector<1x8x1xf32>
    %300 = vector.shape_cast %299 : vector<1x8x1xf32> to vector<8x1xf32>
    %301 = vector.broadcast %300 : vector<8x1xf32> to vector<8x16xf32>
    %302 = arith.addf %298, %301 : vector<8x16xf32>
    %cst_198 = arith.constant 0.000000e+00 : f32
    %303 = vector.broadcast %cst_198 : f32 to vector<8x16xf32>
    %304 = arith.maximumf %302, %303 : vector<8x16xf32>
    %305 = vector.extract_strided_slice %245 {offsets = [1, 0, 0], sizes = [1, 8, 8], strides = [1, 1, 1]} : vector<4x8x8xf32> to vector<1x8x8xf32>
    %306 = vector.shape_cast %305 : vector<1x8x8xf32> to vector<8x8xf32>
    %cst_199 = arith.constant dense<0.000000e+00> : vector<8x16xf32>
    %307 = tpu.matmul %306, %304, %cst_199 {dimension_numbers = #tpu.dot_dimension_numbers<[1], [0], [0], [1], [0, 0, 1, 1], [], []>} : vector<8x8xf32>, vector<8x16xf32>, vector<8x16xf32> -> vector<8x16xf32>
    %308 = vector.extract_strided_slice %247 {offsets = [1, 0, 0], sizes = [1, 8, 1], strides = [1, 1, 1]} : vector<4x8x1xf32> to vector<1x8x1xf32>
    %309 = vector.shape_cast %308 : vector<1x8x1xf32> to vector<8x1xf32>
    %310 = vector.broadcast %309 : vector<8x1xf32> to vector<8x16xf32>
    %311 = arith.addf %307, %310 : vector<8x16xf32>
    %312 = arith.addf %290, %311 : vector<8x16xf32>
    %c0_200 = arith.constant 0 : index
    %c8_201 = arith.constant 8 : index
    %313 = vector.load %arg19[%c0_200, %c8_201] : memref<8x32xf32, #tpu.memory_space<vmem>>, vector<8x16xf32>
    tpu.vector_store %arg19[%c0_200, %c8_201], %312 {strides = array<i32>} : memref<8x32xf32, #tpu.memory_space<vmem>>, vector<8x16xf32>,
    %c0_202 = arith.constant 0 : index
    %c4_203 = arith.constant 4 : index
    %314 = vector.load %arg19[%c0_202, %c4_203] : memref<8x32xf32, #tpu.memory_space<vmem>>, vector<8x16xf32>
    %c0_204 = arith.constant 0 : index
    %c8_205 = arith.constant 8 : index
    %315 = vector.load %arg19[%c0_204, %c8_205] : memref<8x32xf32, #tpu.memory_space<vmem>>, vector<8x16xf32>
    %c0_206 = arith.constant 0 : index
    %c12_207 = arith.constant 12 : index
    %316 = vector.load %arg19[%c0_206, %c12_207] : memref<8x32xf32, #tpu.memory_space<vmem>>, vector<8x16xf32>
    %317 = tpu.concatenate %314, %315, %316 in 0 : vector<8x16xf32>, vector<8x16xf32>, vector<8x16xf32> -> vector<24x16xf32>
    %318 = vector.extract_strided_slice %241 {offsets = [2, 0, 0], sizes = [1, 8, 24], strides = [1, 1, 1]} : vector<4x8x24xf32> to vector<1x8x24xf32>
    %319 = vector.shape_cast %318 : vector<1x8x24xf32> to vector<8x24xf32>
    %cst_208 = arith.constant dense<0.000000e+00> : vector<8x16xf32>
    %320 = tpu.matmul %319, %317, %cst_208 {dimension_numbers = #tpu.dot_dimension_numbers<[1], [0], [0], [1], [0, 0, 1, 1], [], []>} : vector<8x24xf32>, vector<24x16xf32>, vector<8x16xf32> -> vector<8x16xf32>
    %321 = vector.extract_strided_slice %243 {offsets = [2, 0, 0], sizes = [1, 8, 1], strides = [1, 1, 1]} : vector<4x8x1xf32> to vector<1x8x1xf32>
    %322 = vector.shape_cast %321 : vector<1x8x1xf32> to vector<8x1xf32>
    %323 = vector.broadcast %322 : vector<8x1xf32> to vector<8x16xf32>
    %324 = arith.addf %320, %323 : vector<8x16xf32>
    %cst_209 = arith.constant 0.000000e+00 : f32
    %325 = vector.broadcast %cst_209 : f32 to vector<8x16xf32>
    %326 = arith.maximumf %324, %325 : vector<8x16xf32>
    %327 = vector.extract_strided_slice %245 {offsets = [2, 0, 0], sizes = [1, 8, 8], strides = [1, 1, 1]} : vector<4x8x8xf32> to vector<1x8x8xf32>
    %328 = vector.shape_cast %327 : vector<1x8x8xf32> to vector<8x8xf32>
    %cst_210 = arith.constant dense<0.000000e+00> : vector<8x16xf32>
    %329 = tpu.matmul %328, %326, %cst_210 {dimension_numbers = #tpu.dot_dimension_numbers<[1], [0], [0], [1], [0, 0, 1, 1], [], []>} : vector<8x8xf32>, vector<8x16xf32>, vector<8x16xf32> -> vector<8x16xf32>
    %330 = vector.extract_strided_slice %247 {offsets = [2, 0, 0], sizes = [1, 8, 1], strides = [1, 1, 1]} : vector<4x8x1xf32> to vector<1x8x1xf32>
    %331 = vector.shape_cast %330 : vector<1x8x1xf32> to vector<8x1xf32>
    %332 = vector.broadcast %331 : vector<8x1xf32> to vector<8x16xf32>
    %333 = arith.addf %329, %332 : vector<8x16xf32>
    %334 = arith.addf %312, %333 : vector<8x16xf32>
    %c0_211 = arith.constant 0 : index
    %c8_212 = arith.constant 8 : index
    %335 = vector.load %arg19[%c0_211, %c8_212] : memref<8x32xf32, #tpu.memory_space<vmem>>, vector<8x16xf32>
    tpu.vector_store %arg19[%c0_211, %c8_212], %334 {strides = array<i32>} : memref<8x32xf32, #tpu.memory_space<vmem>>, vector<8x16xf32>,
    %c0_213 = arith.constant 0 : index
    %c0_214 = arith.constant 0 : index
    %336 = vector.load %arg19[%c0_213, %c0_214] : memref<8x32xf32, #tpu.memory_space<vmem>>, vector<8x16xf32>
    %c0_215 = arith.constant 0 : index
    %c8_216 = arith.constant 8 : index
    %337 = vector.load %arg19[%c0_215, %c8_216] : memref<8x32xf32, #tpu.memory_space<vmem>>, vector<8x16xf32>
    %c0_217 = arith.constant 0 : index
    %c16_218 = arith.constant 16 : index
    %338 = vector.load %arg19[%c0_217, %c16_218] : memref<8x32xf32, #tpu.memory_space<vmem>>, vector<8x16xf32>
    %339 = tpu.concatenate %336, %337, %338 in 0 : vector<8x16xf32>, vector<8x16xf32>, vector<8x16xf32> -> vector<24x16xf32>
    %340 = vector.extract_strided_slice %241 {offsets = [3, 0, 0], sizes = [1, 8, 24], strides = [1, 1, 1]} : vector<4x8x24xf32> to vector<1x8x24xf32>
    %341 = vector.shape_cast %340 : vector<1x8x24xf32> to vector<8x24xf32>
    %cst_219 = arith.constant dense<0.000000e+00> : vector<8x16xf32>
    %342 = tpu.matmul %341, %339, %cst_219 {dimension_numbers = #tpu.dot_dimension_numbers<[1], [0], [0], [1], [0, 0, 1, 1], [], []>} : vector<8x24xf32>, vector<24x16xf32>, vector<8x16xf32> -> vector<8x16xf32>
    %343 = vector.extract_strided_slice %243 {offsets = [3, 0, 0], sizes = [1, 8, 1], strides = [1, 1, 1]} : vector<4x8x1xf32> to vector<1x8x1xf32>
    %344 = vector.shape_cast %343 : vector<1x8x1xf32> to vector<8x1xf32>
    %345 = vector.broadcast %344 : vector<8x1xf32> to vector<8x16xf32>
    %346 = arith.addf %342, %345 : vector<8x16xf32>
    %cst_220 = arith.constant 0.000000e+00 : f32
    %347 = vector.broadcast %cst_220 : f32 to vector<8x16xf32>
    %348 = arith.maximumf %346, %347 : vector<8x16xf32>
    %349 = vector.extract_strided_slice %245 {offsets = [3, 0, 0], sizes = [1, 8, 8], strides = [1, 1, 1]} : vector<4x8x8xf32> to vector<1x8x8xf32>
    %350 = vector.shape_cast %349 : vector<1x8x8xf32> to vector<8x8xf32>
    %cst_221 = arith.constant dense<0.000000e+00> : vector<8x16xf32>
    %351 = tpu.matmul %350, %348, %cst_221 {dimension_numbers = #tpu.dot_dimension_numbers<[1], [0], [0], [1], [0, 0, 1, 1], [], []>} : vector<8x8xf32>, vector<8x16xf32>, vector<8x16xf32> -> vector<8x16xf32>
    %352 = vector.extract_strided_slice %247 {offsets = [3, 0, 0], sizes = [1, 8, 1], strides = [1, 1, 1]} : vector<4x8x1xf32> to vector<1x8x1xf32>
    %353 = vector.shape_cast %352 : vector<1x8x1xf32> to vector<8x1xf32>
    %354 = vector.broadcast %353 : vector<8x1xf32> to vector<8x16xf32>
    %355 = arith.addf %351, %354 : vector<8x16xf32>
    %356 = arith.addf %334, %355 : vector<8x16xf32>
    %cst_222 = arith.constant dense<0.000000e+00> : vector<6x16xf32>
    %357 = tpu.matmul %249, %356, %cst_222 {dimension_numbers = #tpu.dot_dimension_numbers<[1], [0], [0], [1], [0, 0, 1, 1], [], []>} : vector<6x8xf32>, vector<8x16xf32>, vector<6x16xf32> -> vector<6x16xf32>
    %358 = vector.broadcast %251 : vector<6x1xf32> to vector<6x16xf32>
    %359 = arith.addf %357, %358 : vector<6x16xf32>
    %c2 = arith.constant 2 : index
    %c0_223 = arith.constant 0 : index
    %c0_224 = arith.constant 0 : index
    %c0_225 = arith.constant 0 : index
    %360 = vector.load %arg18[%c2, %c0_223, %c0_224, %c0_225] : memref<3x1x6x16xf32, #tpu.memory_space<vmem>>, vector<1x1x6x16xf32>
    %361 = vector.shape_cast %360 : vector<1x1x6x16xf32> to vector<6x16xf32>
    %362 = vector.shape_cast %359 : vector<6x16xf32> to vector<1x1x6x16xf32>
    tpu.vector_store %arg18[%c2, %c0_223, %c0_224, %c0_225], %362 {strides = array<i32>} : memref<3x1x6x16xf32, #tpu.memory_space<vmem>>, vector<1x1x6x16xf32>,
    return
  }
  func.func @transform_0(%arg0: i32) -> (i32, i32, i32) {
    %c0_i32 = arith.constant 0 : i32
    %c0_i32_0 = arith.constant 0 : i32
    %c0_i32_1 = arith.constant 0 : i32
    return %arg0, %c0_i32, %c0_i32_0 : i32, i32, i32
  }
  func.func @transform_1(%arg0: i32) -> (i32, i32) {
    %c0_i32 = arith.constant 0 : i32
    %c0_i32_0 = arith.constant 0 : i32
    %c0_i32_1 = arith.constant 0 : i32
    return %c0_i32, %c0_i32_0 : i32, i32
  }
  func.func @transform_2(%arg0: i32) -> (i32, i32) {
    %c0_i32 = arith.constant 0 : i32
    %c0_i32_0 = arith.constant 0 : i32
    %c0_i32_1 = arith.constant 0 : i32
    return %c0_i32, %c0_i32_0 : i32, i32
  }
  func.func @transform_3(%arg0: i32) -> (i32, i32, i32) {
    %c0_i32 = arith.constant 0 : i32
    %c0_i32_0 = arith.constant 0 : i32
    %c0_i32_1 = arith.constant 0 : i32
    %c0_i32_2 = arith.constant 0 : i32
    return %c0_i32, %c0_i32_0, %c0_i32_1 : i32, i32, i32
  }
  func.func @transform_4(%arg0: i32) -> (i32, i32, i32) {
    %c0_i32 = arith.constant 0 : i32
    %c0_i32_0 = arith.constant 0 : i32
    %c0_i32_1 = arith.constant 0 : i32
    %c0_i32_2 = arith.constant 0 : i32
    return %c0_i32, %c0_i32_0, %c0_i32_1 : i32, i32, i32
  }
  func.func @transform_5(%arg0: i32) -> (i32, i32, i32) {
    %c0_i32 = arith.constant 0 : i32
    %c0_i32_0 = arith.constant 0 : i32
    %c0_i32_1 = arith.constant 0 : i32
    %c0_i32_2 = arith.constant 0 : i32
    return %c0_i32, %c0_i32_0, %c0_i32_1 : i32, i32, i32
  }
  func.func @transform_6(%arg0: i32) -> (i32, i32, i32) {
    %c0_i32 = arith.constant 0 : i32
    %c0_i32_0 = arith.constant 0 : i32
    %c0_i32_1 = arith.constant 0 : i32
    %c0_i32_2 = arith.constant 0 : i32
    return %c0_i32, %c0_i32_0, %c0_i32_1 : i32, i32, i32
  }
  func.func @transform_7(%arg0: i32) -> (i32, i32) {
    %c0_i32 = arith.constant 0 : i32
    %c0_i32_0 = arith.constant 0 : i32
    %c0_i32_1 = arith.constant 0 : i32
    return %c0_i32, %c0_i32_0 : i32, i32
  }
  func.func @transform_8(%arg0: i32) -> (i32, i32) {
    %c0_i32 = arith.constant 0 : i32
    %c0_i32_0 = arith.constant 0 : i32
    %c0_i32_1 = arith.constant 0 : i32
    return %c0_i32, %c0_i32_0 : i32, i32
  }
  func.func @transform_9(%arg0: i32) -> (i32, i32, i32) {
    %c0_i32 = arith.constant 0 : i32
    %c0_i32_0 = arith.constant 0 : i32
    %c0_i32_1 = arith.constant 0 : i32
    %c0_i32_2 = arith.constant 0 : i32
    return %c0_i32, %c0_i32_0, %c0_i32_1 : i32, i32, i32
  }
  func.func @transform_10(%arg0: i32) -> (i32, i32, i32) {
    %c0_i32 = arith.constant 0 : i32
    %c0_i32_0 = arith.constant 0 : i32
    %c0_i32_1 = arith.constant 0 : i32
    %c0_i32_2 = arith.constant 0 : i32
    return %c0_i32, %c0_i32_0, %c0_i32_1 : i32, i32, i32
  }
  func.func @transform_11(%arg0: i32) -> (i32, i32, i32, i32) {
    %c0_i32 = arith.constant 0 : i32
    %c0_i32_0 = arith.constant 0 : i32
    %c0_i32_1 = arith.constant 0 : i32
    %c0_i32_2 = arith.constant 0 : i32
    %c0_i32_3 = arith.constant 0 : i32
    return %c0_i32, %c0_i32_0, %c0_i32_1, %c0_i32_2 : i32, i32, i32, i32
  }
  func.func @transform_12(%arg0: i32) -> (i32, i32, i32, i32) {
    %c0_i32 = arith.constant 0 : i32
    %c0_i32_0 = arith.constant 0 : i32
    %c0_i32_1 = arith.constant 0 : i32
    %c0_i32_2 = arith.constant 0 : i32
    %c0_i32_3 = arith.constant 0 : i32
    return %c0_i32, %c0_i32_0, %c0_i32_1, %c0_i32_2 : i32, i32, i32, i32
  }
  func.func @transform_13(%arg0: i32) -> (i32, i32, i32, i32) {
    %c0_i32 = arith.constant 0 : i32
    %c0_i32_0 = arith.constant 0 : i32
    %c0_i32_1 = arith.constant 0 : i32
    %c0_i32_2 = arith.constant 0 : i32
    %c0_i32_3 = arith.constant 0 : i32
    return %c0_i32, %c0_i32_0, %c0_i32_1, %c0_i32_2 : i32, i32, i32, i32
  }
  func.func @transform_14(%arg0: i32) -> (i32, i32, i32, i32) {
    %c0_i32 = arith.constant 0 : i32
    %c0_i32_0 = arith.constant 0 : i32
    %c0_i32_1 = arith.constant 0 : i32
    %c0_i32_2 = arith.constant 0 : i32
    %c0_i32_3 = arith.constant 0 : i32
    return %c0_i32, %c0_i32_0, %c0_i32_1, %c0_i32_2 : i32, i32, i32, i32
  }
  func.func @transform_15(%arg0: i32) -> (i32, i32, i32) {
    %c0_i32 = arith.constant 0 : i32
    %c0_i32_0 = arith.constant 0 : i32
    %c0_i32_1 = arith.constant 0 : i32
    %c0_i32_2 = arith.constant 0 : i32
    return %c0_i32, %c0_i32_0, %c0_i32_1 : i32, i32, i32
  }
  func.func @transform_16(%arg0: i32) -> (i32, i32, i32) {
    %c0_i32 = arith.constant 0 : i32
    %c0_i32_0 = arith.constant 0 : i32
    %c0_i32_1 = arith.constant 0 : i32
    %c0_i32_2 = arith.constant 0 : i32
    return %c0_i32, %c0_i32_0, %c0_i32_1 : i32, i32, i32
  }
  func.func @transform_17(%arg0: i32) -> (i32, i32, i32, i32) {
    %c0_i32 = arith.constant 0 : i32
    %c0_i32_0 = arith.constant 0 : i32
    %c0_i32_1 = arith.constant 0 : i32
    %c0_i32_2 = arith.constant 0 : i32
    return %c0_i32, %arg0, %c0_i32_0, %c0_i32_1 : i32, i32, i32, i32
  }
}

</mosaic_0001>

<bundles_post_ra>
// kernel: tpu_custom_call.1
= control target key start
LH: loop header
LB: loop body
LE: loop exit
PB: predicated region body
PF: predicated region fallthrough
CT: control target
= control target key end

     0   :  { %s4399_s0 = inlined_call_operand.vmem [shape: f32[2,12,16], index: 0, kind: input, shape index: {}]   ;;  %s4400_s1 = inlined_call_operand.vmem [shape: f32[8,12], index: 1, kind: input, shape index: {}]   ;;  %s4401_s2 = inlined_call_operand.vmem [shape: f32[8,1], index: 2, kind: input, shape index: {}]   ;;  %s4402_s3 = inlined_call_operand.vmem [shape: f32[4,8,24], index: 3, kind: input, shape index: {}]   ;;  %s4403_s4 = inlined_call_operand.vmem [shape: f32[4,8,1], index: 4, kind: input, shape index: {}]   ;;  %s4404_s5 = inlined_call_operand.vmem [shape: f32[4,8,8], index: 5, kind: input, shape index: {}]   ;;  %s4405_s6 = inlined_call_operand.vmem [shape: f32[4,8,1], index: 6, kind: input, shape index: {}]   ;;  %s4406_s7 = inlined_call_operand.vmem [shape: f32[6,8], index: 7, kind: input, shape index: {}]   ;;  %s4407_s8 = inlined_call_operand.vmem [shape: f32[6,1], index: 8, kind: input, shape index: {}]   ;;  %s4408_s9 = inlined_call_operand.vmem [shape: f32[2,8,6], index: 9, kind: input, shape index: {}]   ;;  %s4409_s10 = inlined_call_operand.vmem [shape: f32[2,8,1], index: 10, kind: input, shape index: {}]   ;;  %s4410_s11 = inlined_call_operand.vmem [shape: f32[2,4,8,24], index: 11, kind: input, shape index: {}]   ;;  %s4411_s12 = inlined_call_operand.vmem [shape: f32[2,4,8,1], index: 12, kind: input, shape index: {}]   ;;  %s4412_s13 = inlined_call_operand.vmem [shape: f32[2,4,8,8], index: 13, kind: input, shape index: {}]   ;;  %s4413_s14 = inlined_call_operand.vmem [shape: f32[2,4,8,1], index: 14, kind: input, shape index: {}]   ;;  %s4414_s15 = inlined_call_operand.vmem [shape: f32[2,6,8], index: 15, kind: input, shape index: {}]   ;;  %s4415_s16 = inlined_call_operand.vmem [shape: f32[2,6,1], index: 16, kind: input, shape index: {}]   ;;  %s4416_s17 = inlined_call_operand.vmem [shape: f32[3,2,6,16], index: 17, kind: output, shape index: {}]  }
   0x1   :  { %4433 = sst [smem:[#allocation4_spill]] %s4399_s0 }
   0x2   :  { %4434 = sst [smem:[#allocation5_spill]] %s4400_s1 }
   0x3   :  { %4435 = sst [smem:[#allocation6_spill]] %s4401_s2 }
   0x4   :  { %4436 = sst [smem:[#allocation7_spill]] %s4402_s3 }
   0x5   :  { %4437 = sst [smem:[#allocation8_spill]] %s4403_s4 }
   0x6   :  { %4438 = sst [smem:[#allocation9_spill]] %s4404_s5 }
   0x7   :  { %4439 = sst [smem:[#allocation10_spill]] %s4405_s6 }
   0x8   :  { %4440 = sst [smem:[#allocation11_spill]] %s4406_s7 }
   0x9   :  { %4441 = sst [smem:[#allocation12_spill]] %s4407_s8 }
   0xa   :  { %s3953_s24 = smov 0   ;;  %s3955_s25 = smov 0  }
   0xb   :  { %s3957_s26 = smov 0  }
   0xc LB: > { %s3966_s27 = sadd.s32 4294967295, %s3848_s26   ;;  %s3968_s28 = sadd.s32 1, %s3848_s26   ;;  %s3848_s26 = sphi %s3957_s26, %s4462_s26   ;;  %s3844_s25 = sphi %s3955_s25, %s4461_s25   ;;  %s3840_s24 = sphi %s3953_s24, %s4460_s24  }
   0xd   : > { %s393_s29 = ssub.s32 %s3848_s26, %s3968_s28  ;;  %s396_s0 = sadd.s32 1, %s3844_s25 }
   0xe   : > { %p394_p0 = scmp.eq.s32.totalorder %s393_s29, 0  ;;  %p406_p1 = scmp.ne.s32.totalorder %s3844_s25, %s3840_s24 }
   0xf   : > { %p407_p2 = scmp.eq.s32.totalorder %s3966_s27, 1  ;;  %p3361_p3 = scmp.ge.s32.totalorder %s3848_s26, 1 }
  0x10   : > { %s3976_s30 = scalar_select %p394_p0, %s3844_s25, %s396_s0  }
  0x11   : > { %p3978_p4 = por %p407_p2, %p406_p1  ;;  %p487_p5 = scmp.lt.s32.totalorder %s3848_s26, 3 }
  0x13   : > { %p488_p6 = pnand %p3361_p3, %p487_p5 }
  0x14   : > { %p538_p7 = scmp.lt.s32.totalorder (!%p488_p6), %s3966_s27, 1  ;;  %v3850_v0 = vmov (!%p488_p6), 0.0|0.0   ;;  %s4443_s2 = sld [smem:[#allocation6_spill]] (!%p488_p6)  ;;  %vm3851_vm0 = vmmov (!%p488_p6), 0   ;;  %v3852_v2 = vmov (!%p488_p6), 0.0   ;;  %v3853_v3 = vmov (!%p488_p6), 0  }
  0x15   : > { %491 = sbr.rel (%p488_p6) target bundleno = 10651 (0x299b), region = 88  ;;  %3708 = vmatprep.subr.bf16.mxu0 (!%p488_p6), %v3850_v0  ;;  %3712 = vmatprep.subr.bf16.mxu1 (!%p488_p6), %v3850_v0  ;;  %vm576_vm1 = vcmask (!%p488_p6), 1043456   ;;  %s4444_s26 = sld [smem:[#allocation4_spill]] (!%p488_p6)  ;;  %vm3854_vm2 = vmmov (!%p488_p6), 1   ;;  %vm572_vm4 = vcmask (!%p488_p6), 97280   ;;  %vm543_vm5 = vcmask (!%p488_p6), 261120  }
  0x16   : > { %3512 = vmatprep.mubr.msk.f32.mxu0 (!%p488_p6), %vm3851_vm0, %v3852_v2  ;;  %3786 = vset.pattern.permute.xlu0 (!%p488_p6), %v3853_v3  ;;  %vm3710_vm3 = vmpackc.low (!%p488_p6), %vm576_vm1, %vm3854_vm2  ;;  %s4445_s1 = sld [smem:[#allocation5_spill]] (!%p488_p6)  ;;  %544 = vst.msk [vmem:[#allocation2] sm:$0xff] (!%p488_p6), %vm543_vm5, %v3852_v2  ;;  %vm654_vm6 = vcmask (!%p488_p6), 195648   ;;  %s4421_s22 = smov (!%p488_p6), 126   ;;  %vm676_vm7 = vcmask (!%p488_p6), 195584   ;;  %vm756_vm8 = vcmask (!%p488_p6), 64512  }
  0x17   : > { %3521 = vmatprep.mubr.msk.f32.mxu1 (!%p488_p6), %vm3851_vm0, %v3852_v2  ;;  %3792 = vset.pattern.permute.xlu1 (!%p488_p6), %v3853_v3  ;;  %s4417_s23 = smov (!%p488_p6), 121   ;;  %s4446_s4 = sld [smem:[#allocation8_spill]] (!%p488_p6)  ;;  %vm1434_vm9 = vcmask (!%p488_p6), 128000   ;;  %vm1487_vm10 = vcmask (!%p488_p6), 1045504   ;;  %vm1483_vm11 = vcmask (!%p488_p6), 48128  }
  0x18   : > { %s4447_s3 = sld [smem:[#allocation7_spill]] (!%p488_p6)  ;;  %s4448_s6 = sld [smem:[#allocation10_spill]] (!%p488_p6) }
  0x19   : > { %s4449_s5 = sld [smem:[#allocation9_spill]] (!%p488_p6)  ;;  %s4425_s19 = smov (!%p488_p6), 124  }
  0x1a   : > { %v546_v1 = vld [vmem:[%s4443_s2] sm:$0xff] (!%p488_p6)  ;;  %s4450_s8 = sld [smem:[#allocation12_spill]] (!%p488_p6)  ;;  %s4451_s7 = sld [smem:[#allocation11_spill]] (!%p488_p6) }
  0x1b   : > { %569 = vperm.xlu0 (!%p488_p6), %3786, %v546_v1   ;;  %s4452_s2 = smov (!%p488_p6), 8  }
  0x1c   : > { %s539_s20 = scalar_select %p538_p7, %s3966_s27, 1  ;;  %v545_v7 = vld [vmem:[%s4445_s1] sm:$0xff] }
  0x1d   : > { %v551_v17 = vld [vmem:[%s4446_s4] sm:$0xff]  ;;  %s4423_s1 = smov 122   ;;  %v552_v42 = vld [vmem:[%s4446_s4 + $0x8] sm:$0xff]  ;;  %v553_v3 = vld [vmem:[%s4446_s4 + $0x10] sm:$0xff] }
  0x1e   : > { %s3422_s21 = sshll.u32 %s539_s20, 4  ;;  %s4427_s20 = smov 8   ;;  %v547_v22 = vld [vmem:[%s4447_s3] sm:$0xff]  ;;  %v560_v41 = vld [vmem:[%s4448_s6 + $0x8] sm:$0xff]  ;;  %v561_v1 = vld [vmem:[%s4448_s6 + $0x10] sm:$0xff] }
  0x1f   : > { %s542_s29 = scalar_lea.vmem %s4444_s26, %s3422_s21  ;;  %s4419_s21 = smov 127   ;;  %v559_v24 = vld [vmem:[%s4448_s6] sm:$0xff]  ;;  %v548_v47 = vld [vmem:[%s4447_s3 + $0x8] sm:$0xff] }
  0x20   : > { %v565_v4 = vld [vmem:[%s542_s29] sm:$0xff]  ;;  %v566_v5 = vld [vmem:[%s542_s29 + $0x8] sm:$0xf]  ;;  %s4455_s26 = smov 121  }
  0x21   : > { %v3709_v6 = vpack.c.bf16 %v566_v5, %v565_v4  ;;  %v555_v30 = vld [vmem:[%s4449_s5] sm:$0xff]  ;;  %v556_v54 = vld [vmem:[%s4449_s5 + $0x8] sm:$0xff] }
  0x23   : > { %3711 = vmatpush3.bf16.msk.msra.mxu0 %vm3710_vm3, %v3709_v6  ;;  %v549_v6 = vld [vmem:[%s4447_s3 + $0x10] sm:$0xff] }
  0x24   : > { %3524 = vmatprep.subr.mxu0 %v3852_v2 }
  0x26   : > { %3513 = vmatmul.mubr.msk.f32.vlgmr.msra.gmra.mrb[0].mxu0 %vm572_vm4, %v545_v7 }
  0x27   : > { %3526 = vmatprep.mubr.msk.f32.mxu0 %vm3851_vm0, %v3852_v2 }
  0x9a   : > { %v570_v8 = vpop.permute.xlu0 %569 }
  0xf9   : > { %v646_v9 = vpop.f32.mrb[0].mxu0 }
  0xfa   : > { %v647_v10 = vadd.f32 %v646_v9, %v570_v8  ;;  %v3514_v11 = vpop.f32.mrb[1].mxu0 }
  0xfc   : > { %651 = vrot.lane.b32.xlu0 %v647_v10, %s4427_s20 }
 0x16e   : > { %v652_v12 = vpop.permute.xlu0 %651 }
 0x16f   : > { %655 = vst.msk [vmem:[#allocation2] sm:$0xff] %vm654_vm6, %v652_v12 }
 0x176   : > { %v656_v13 = vld [vmem:[#allocation2] sm:$0xff] }
 0x177   : > { %658 = vrot.lane.b32.xlu1 %v656_v13, %s4419_s21  ;;  %s4431_s21 = smov 120  }
 0x17b   : > { %660 = vrot.lane.b32.xlu1 %v656_v13, %s4421_s22 }
 0x1e9   : > { %v659_v14 = vpop.permute.xlu1 %658 }
 0x1ea   : > { %v3787_v15 = vpack.i.bf16 %v659_v14, %v656_v13  ;;  %v557_v13 = vld [vmem:[%s4449_s5 + $0x10] sm:$0xff] }
 0x1ec   : > { %3788 = vrot.lane.b32.xlu0 %v3787_v15, %s4417_s23 }
 0x1ed   : > { %v661_v16 = vpop.permute.xlu1 %660 }
 0x1ee   : > { %671 = vrot.lane.b32.xlu1 %v661_v16, %s4417_s23 }
 0x1f0   : > { %664 = vperm.xlu0 %3786, %v551_v17  }
 0x1f2   : > { %753 = vperm.xlu1 %3792, %v559_v24   ;;  %v564_v24 = vld [vmem:[%s4450_s8] sm:$0x3f] }
 0x25e   : > { %v3789_v18 = vpop.permute.xlu0 %3788 }
 0x25f   : > { %v3791_v19 = vunpack.i.h.bf16 %v3789_v18  ;;  %v3790_v20 = vunpack.i.l.bf16 %v3789_v18 }
 0x260   : > { %v672_v23 = vpop.permute.xlu1 %671 }
 0x261   : > { %v3713_v21 = vpack.c.bf16 %v3791_v19, %v3790_v20 }
 0x263   : > { %3714 = vmatpush3.bf16.msra.mxu1 %v3713_v21  ;;  %v562_v21 = vld [vmem:[%s4448_s6 + $0x18] sm:$0xff] }
 0x264   : > { %3519 = vmatprep.subr.mxu1 %v3852_v2 }
 0x267   : > { %3520 = vmatpush3.msra.mxu1 %v672_v23  ;;  %v1437_v23 = vld [vmem:[%s4409_s10] sm:$0xff] }
 0x268   : > { %3522 = vmatmul.mubr.msk.f32.vlgmr.msra.gmra.mrb[0].mxu1 %vm676_vm7, %v547_v22  ;;  %3715 = vmatprep.subr.bf16.mxu1 %v3850_v0  ;;  %v554_v22 = vld [vmem:[%s4446_s4 + $0x18] sm:$0xff]  ;;  %s3419_s4 = sshll.u32 (%p3978_p4), %s3966_s27, 3 }
 0x269   : > { %3535 = vmatprep.mubr.msk.f32.mxu1 %vm3851_vm0, %v3852_v2 }
 0x26f   : > { %v665_v25 = vpop.permute.xlu0 %664 }
 0x271   : > { %v754_v31 = vpop.permute.xlu1 %753 }
 0x33b   : > { %v746_v26 = vpop.f32.mrb[0].mxu1 }
 0x33c   : > { %v747_v27 = vadd.f32 %v746_v26, %v665_v25  ;;  %v3523_v28 = vpop.f32.mrb[1].mxu1 }
 0x33e   : > { %v750_v29 = vmax.f32 %v747_v27, 0.0  ;;  %v550_v27 = vld [vmem:[%s4447_s3 + $0x18] sm:$0xff]  ;;  %s4458_s3 = smov 120  }
 0x340   : > { %3525 = vmatpush3.msra.mxu0 %v750_v29 }
 0x341   : > { %3527 = vmatmul.mubr.msk.f32.vlgmr.msra.gmra.mrb[2].mxu0 %vm756_vm8, %v555_v30  ;;  %3538 = vmatprep.subr.mxu0 %v3852_v2 }
 0x342   : > { %3540 = vmatprep.mubr.msk.f32.mxu0 %vm3851_vm0, %v3852_v2 }
 0x414   : > { %v826_v32 = vpop.f32.mrb[2].mxu0 }
 0x415   : > { %v827_v33 = vadd.f32 %v826_v32, %v754_v31  ;;  %v3528_v34 = vpop.f32.mrb[3].mxu0 }
 0x416   : > { %v558_v34 = vld [vmem:[%s4449_s5 + $0x18] sm:$0xff]  ;;  %s4459_s5 = smov 112  }
 0x417   : > { %v830_v35 = vadd.f32 %v827_v33, %v647_v10 }
 0x419   : > { %832 = vrot.lane.b32.xlu0 %v830_v35, %s4427_s20 }
 0x48b   : > { %v833_v36 = vpop.permute.xlu0 %832 }
 0x48c   : > { %835 = vst.msk [vmem:[#allocation2] sm:$0xff] %vm654_vm6, %v833_v36 }
 0x493   : > { %v836_v37 = vld [vmem:[#allocation2] sm:$0xff] }
 0x494   : > { %840 = vrot.lane.b32.xlu0 %v836_v37, %s4425_s19  ;;  %838 = vrot.lane.b32.xlu1 %v836_v37, %s4421_s22  ;;  %s535_s22 = sand.u32 1, %s3840_s24  }
 0x495   : > { %s3748_s29 = smul.u32 24, %s535_s22 }
 0x497   : > { %s4123_s0 = scalar_lea.vmem [#allocation3], %s3748_s29  ;;  %s3266_s29 = scalar_lea.vmem (%p3978_p4), %s4416_s17, %s3419_s4 }
 0x506   : > { %v841_v38 = vpop.permute.xlu0 %840  ;;  %v839_v39 = vpop.permute.xlu1 %838 }
 0x507   : > { %v3793_v40 = vpack.i.bf16 %v839_v39, %v836_v37  ;;  %851 = vrot.lane.b32.xlu0 %v841_v38, %s4423_s1 }
 0x509   : > { %3794 = vrot.lane.b32.xlu1 %v3793_v40, %s4423_s1  ;;  %s4429_s1 = smov 112   ;;  %v563_v40 = vld [vmem:[%s4451_s7] sm:$0x3f] }
 0x50b   : > { %932 = vperm.xlu0 %3786, %v560_v41  }
 0x50d   : > { %844 = vperm.xlu1 %3792, %v552_v42  }
 0x579   : > { %v852_v48 = vpop.permute.xlu0 %851 }
 0x57b   : > { %v3795_v43 = vpop.permute.xlu1 %3794 }
 0x57c   : > { %v3797_v44 = vunpack.i.h.bf16 %v3795_v43  ;;  %v3796_v45 = vunpack.i.l.bf16 %v3795_v43 }
 0x57e   : > { %v3716_v46 = vpack.c.bf16 %v3797_v44, %v3796_v45 }
 0x580   : > { %3717 = vmatpush3.bf16.msra.mxu1 %v3716_v46 }
 0x581   : > { %3533 = vmatprep.subr.mxu1 %v3852_v2 }
 0x584   : > { %3534 = vmatpush3.msra.mxu1 %v852_v48 }
 0x585   : > { %3536 = vmatmul.mubr.msk.f32.vlgmr.msra.gmra.mrb[2].mxu1 %vm676_vm7, %v548_v47  ;;  %3552 = vmatprep.subr.mxu1 %v3852_v2 }
 0x586   : > { %3554 = vmatprep.mubr.msk.f32.mxu1 %vm3851_vm0, %v3852_v2 }
 0x58a   : > { %v933_v55 = vpop.permute.xlu0 %932 }
 0x58c   : > { %v845_v49 = vpop.permute.xlu1 %844 }
 0x658   : > { %v925_v50 = vpop.f32.mrb[2].mxu1 }
 0x659   : > { %v926_v51 = vadd.f32 %v925_v50, %v845_v49  ;;  %v3537_v52 = vpop.f32.mrb[3].mxu1 }
 0x65b   : > { %v929_v53 = vmax.f32 %v926_v51, 0.0 }
 0x65d   : > { %3539 = vmatpush3.msra.mxu0 %v929_v53 }
 0x65e   : > { %3541 = vmatmul.mubr.msk.f32.vlgmr.msra.gmra.mrb[4].mxu0 %vm756_vm8, %v556_v54  ;;  %3718 = vmatprep.subr.bf16.mxu0 %v3850_v0 }
 0x65f   : > { %3549 = vmatprep.mubr.msk.f32.mxu0 %vm3851_vm0, %v3852_v2 }
 0x731   : > { %v1004_v56 = vpop.f32.mrb[4].mxu0 }
 0x732   : > { %v1005_v57 = vadd.f32 %v1004_v56, %v933_v55  ;;  %v3542_v58 = vpop.f32.mrb[5].mxu0 }
 0x734   : > { %v1008_v59 = vadd.f32 %v1005_v57, %v830_v35 }
 0x736   : > { %1010 = vrot.lane.b32.xlu1 %v1008_v59, %s4427_s20 }
 0x7a8   : > { %v1011_v60 = vpop.permute.xlu1 %1010 }
 0x7a9   : > { %1013 = vst.msk [vmem:[#allocation2] sm:$0xff] %vm654_vm6, %v1011_v60 }
 0x7b0   : > { %v1014_v61 = vld [vmem:[#allocation2] sm:$0xff] }
 0x7b1   : > { %1018 = vrot.lane.b32.xlu1 %v1014_v61, %s4431_s21  ;;  %1016 = vrot.lane.b32.xlu0 %v1014_v61, %s4425_s19 }
 0x823   : > { %v1019_v62 = vpop.permute.xlu1 %1018  ;;  %v1017_v63 = vpop.permute.xlu0 %1016 }
 0x824   : > { %1027 = vrot.lane.b32.xlu1 %v1019_v62, %s4425_s19  ;;  %1025 = vrot.lane.b32.xlu0 %v1017_v63, %s4425_s19  ;;  %s4454_s19 = smov 127  }
 0x828   : > { %1108 = vperm.xlu1 %3792, %v561_v1   ;;  %1022 = vperm.xlu0 %3786, %v553_v3  }
 0x896   : > { %v1026_v4 = vpop.permute.xlu0 %1025  ;;  %v1028_v7 = vpop.permute.xlu1 %1027 }
 0x897   : > { %v3719_v5 = vpack.c.bf16 %v1026_v4, %v1017_v63 }
 0x899   : > { %3720 = vmatpush3.bf16.msra.mxu0 %v3719_v5  ;;  %v1436_v5 = vld [vmem:[%s4408_s9] sm:$0xff] }
 0x89a   : > { %3547 = vmatprep.subr.mxu0 %v3852_v2 }
 0x89d   : > { %3548 = vmatpush3.msra.mxu0 %v1028_v7 }
 0x89e   : > { %3550 = vmatmul.mubr.msk.f32.vlgmr.msra.gmra.mrb[6].mxu0 %vm676_vm7, %v549_v6  ;;  %3566 = vmatprep.subr.mxu0 %v3852_v2 }
 0x89f   : > { %3568 = vmatprep.mubr.msk.f32.mxu0 %vm3851_vm0, %v3852_v2 }
 0x8a7   : > { %v1023_v8 = vpop.permute.xlu0 %1022  ;;  %v1109_v14 = vpop.permute.xlu1 %1108 }
 0x971   : > { %v1101_v9 = vpop.f32.mrb[6].mxu0 }
 0x972   : > { %v1102_v10 = vadd.f32 %v1101_v9, %v1023_v8  ;;  %v3551_v11 = vpop.f32.mrb[7].mxu0 }
 0x974   : > { %v1105_v12 = vmax.f32 %v1102_v10, 0.0 }
 0x976   : > { %3553 = vmatpush3.msra.mxu1 %v1105_v12 }
 0x977   : > { %3555 = vmatmul.mubr.msk.f32.vlgmr.msra.gmra.mrb[4].mxu1 %vm756_vm8, %v557_v13  ;;  %3721 = vmatprep.subr.bf16.mxu1 %v3850_v0 }
 0x978   : > { %3563 = vmatprep.mubr.msk.f32.mxu1 %vm3851_vm0, %v3852_v2 }
 0xa4a   : > { %v1180_v15 = vpop.f32.mrb[4].mxu1 }
 0xa4b   : > { %v1181_v16 = vadd.f32 %v1180_v15, %v1109_v14  ;;  %v3556_v17 = vpop.f32.mrb[5].mxu1  ;;  %v1450_v15 = vld [vmem:[%s4413_s14] sm:$0xff] }
 0xa4d   : > { %v1184_v18 = vadd.f32 %v1181_v16, %v1008_v59  ;;  %v1442_v16 = vld [vmem:[%s4411_s12] sm:$0xff] }
 0xa4f   : > { %1186 = vrot.lane.b32.xlu0 %v1184_v18, %s4427_s20  ;;  %s4453_s20 = smov 126  }
 0xac1   : > { %v1187_v19 = vpop.permute.xlu0 %1186 }
 0xac2   : > { %1189 = vst.msk [vmem:[#allocation2] sm:$0xff] %vm654_vm6, %v1187_v19 }
 0xac9   : > { %v1190_v20 = vld [vmem:[#allocation2] sm:$0xff] }
 0xaca   : > { %1195 = vrot.lane.b32.xlu0 %v1190_v20, %s4429_s1  ;;  %1192 = vrot.lane.b32.xlu1 %v1190_v20, %s4431_s21  ;;  %s4456_s21 = smov 124   ;;  %s4457_s1 = smov 122  }
 0xace   : > { %1279 = vperm.xlu0 %3786, %v562_v21   ;;  %1200 = vperm.xlu1 %3792, %v554_v22   ;;  %v1438_v21 = vld [vmem:[%s4410_s11] sm:$0xff] }
 0xad2   : > { %1480 = vperm.xlu0 %3786, %v1437_v23   ;;  %1358 = vperm.xlu1 %3792, %v564_v24  }
 0xb3c   : > { %v1193_v25 = vpop.permute.xlu1 %1192  ;;  %v1196_v28 = vpop.permute.xlu0 %1195 }
 0xb3d   : > { %v3722_v26 = vpack.c.bf16 %v1193_v25, %v1190_v20 }
 0xb3f   : > { %3723 = vmatpush3.bf16.msra.mxu1 %v3722_v26 }
 0xb40   : > { %3561 = vmatprep.subr.mxu1 %v3852_v2 }
 0xb43   : > { %3562 = vmatpush3.msra.mxu1 %v1196_v28  ;;  %v1446_v28 = vld [vmem:[%s4412_s13] sm:$0xff] }
 0xb44   : > { %3564 = vmatmul.mubr.msk.f32.vlgmr.msra.gmra.mrb[6].mxu1 %vm676_vm7, %v550_v27  ;;  %3576 = vmatprep.subr.mxu1 %v3852_v2 }
 0xb45   : > { %3578 = vmatprep.mubr.msk.f32.mxu1 %vm3851_vm0, %v3852_v2 }
 0xb4d   : > { %v1201_v29 = vpop.permute.xlu1 %1200  ;;  %v1280_v35 = vpop.permute.xlu0 %1279 }
 0xb51   : > { %v1359_v41 = vpop.permute.xlu1 %1358  ;;  %v1481_v6 = vpop.permute.xlu0 %1480 }
 0xc17   : > { %v1272_v30 = vpop.f32.mrb[6].mxu1 }
 0xc18   : > { %v1273_v31 = vadd.f32 %v1272_v30, %v1201_v29  ;;  %v3565_v32 = vpop.f32.mrb[7].mxu1 }
 0xc1a   : > { %v1276_v33 = vmax.f32 %v1273_v31, 0.0 }
 0xc1c   : > { %3567 = vmatpush3.msra.mxu0 %v1276_v33 }
 0xc1d   : > { %3569 = vmatmul.mubr.msk.f32.vlgmr.msra.gmra.mrb[8].mxu0 %vm756_vm8, %v558_v34  ;;  %3571 = vmatprep.subr.mxu0 %v3852_v2 }
 0xc1e   : > { %3573 = vmatprep.mubr.msk.f32.mxu0 %vm3851_vm0, %v3852_v2 }
 0xcf0   : > { %v1351_v36 = vpop.f32.mrb[8].mxu0 }
 0xcf1   : > { %v1352_v37 = vadd.f32 %v1351_v36, %v1280_v35  ;;  %v3570_v38 = vpop.f32.mrb[9].mxu0 }
 0xcf3   : > { %v1355_v39 = vadd.f32 %v1352_v37, %v1184_v18 }
 0xcf5   : > { %3572 = vmatpush3.msra.mxu0 %v1355_v39  ;;  %v1451_v39 = vld [vmem:[%s4413_s14 + $0x8] sm:$0xff] }
 0xcf6   : > { %3574 = vmatmul.mubr.msk.f32.vlgmr.msra.gmra.mrb[10].mxu0 %vm756_vm8, %v563_v40  ;;  %3724 = vmatprep.subr.bf16.mxu0 %v3850_v0  ;;  %v1443_v40 = vld [vmem:[%s4411_s12 + $0x8] sm:$0xff] }
 0xcf7   : > { %3587 = vmatprep.mubr.msk.f32.mxu0 %vm3851_vm0, %v3852_v2 }
 0xdc9   : > { %v1430_v42 = vpop.f32.mrb[10].mxu0 }
 0xdca   : > { %v1431_v43 = vadd.f32 %v1430_v42, %v1359_v41  ;;  %v3575_v44 = vpop.f32.mrb[11].mxu0 }
 0xdcc   : > { %1435 = vst.msk [vmem:[%s4123_s0] sm:$0x3f] %vm1434_vm9, %v1431_v43  ;;  %v1456_v45 = vsel %vm1434_vm9, %v1431_v43, -inf }
 0xdcd   : > { %v1457_v46 = vrot.slane %v1456_v45, 4 }
 0xdcf   : > { %v1458_v47 = vmax.f32 %v1456_v45, %v1457_v46  ;;  %v1439_v45 = vld [vmem:[%s4410_s11 + $0x8] sm:$0xff] }
 0xdd1   : > { %v1459_v48 = vrot.slane %v1458_v47, 2 }
 0xdd3   : > { %v1460_v49 = vmax.f32 %v1458_v47, %v1459_v48 }
 0xdd5   : > { %v1461_v50 = vrot.slane %v1460_v49, 1 }
 0xdd7   : > { %v1462_v51 = vmax.f32 %v1460_v49, %v1461_v50 }
 0xdd9   : > { %v1463_v52 = vsub.f32 %v1431_v43, %v1462_v51 }
 0xddb   : > { %v1464_v53 = vmul.f32 1.442695, %v1463_v52  ;;  %v1447_v52 = vld [vmem:[%s4412_s13 + $0x8] sm:$0xff] }
 0xddd   : > { %3818 = vpow2.f32 %v1464_v53 }
 0xde7   : > { %v3819_v54 = vpop.eup %3818 }
 0xde8   : > { %v1466_v55 = vsel %vm1434_vm9, %v3819_v54, 0.0 }
 0xde9   : > { %v1467_v56 = vrot.slane %v1466_v55, 4 }
 0xdeb   : > { %v1468_v57 = vadd.f32 %v1467_v56, %v1466_v55 }
 0xded   : > { %v1469_v58 = vrot.slane %v1468_v57, 2 }
 0xdef   : > { %v1470_v59 = vadd.f32 %v1469_v58, %v1468_v57 }
 0xdf1   : > { %v1471_v60 = vrot.slane %v1470_v59, 1 }
 0xdf3   : > { %v1472_v61 = vadd.f32 %v1471_v60, %v1470_v59 }
 0xdf5   : > { %3820 = vrcp.f32 %v1472_v61 }
 0xdff   : > { %v3821_v62 = vpop.eup %3820 }
 0xe00   : > { %v1474_v63 = vmul.f32 %v3821_v62, %v1472_v61 }
 0xe02   : > { %v1475_v1 = vsub.f32 2.0, %v1474_v63  ;;  %v1444_v63 = vld [vmem:[%s4411_s12 + $0x10] sm:$0xff] }
 0xe04   : > { %v1476_v3 = vmul.f32 %v3821_v62, %v1475_v1  ;;  %v1452_v62 = vld [vmem:[%s4413_s14 + $0x10] sm:$0xff] }
 0xe06   : > { %v1477_v4 = vmul.f32 %v3819_v54, %v1476_v3 }
 0xe08   : > { %3577 = vmatpush3.msk.msra.mxu1 %vm1487_vm10, %v1477_v4  ;;  %v1440_v4 = vld [vmem:[%s4410_s11 + $0x10] sm:$0xff] }
 0xe09   : > { %3579 = vmatmul.mubr.msk.f32.vlgmr.msra.gmra.mrb[8].mxu1 %vm1483_vm11, %v1436_v5  ;;  %3590 = vmatprep.subr.mxu1 %v3852_v2 }
 0xe0a   : > { %3592 = vmatprep.mubr.msk.f32.mxu1 %vm3851_vm0, %v3852_v2 }
 0xedc   : > { %v1557_v7 = vpop.f32.mrb[8].mxu1 }
 0xedd   : > { %v1558_v8 = vadd.f32 %v1557_v7, %v1481_v6  ;;  %v3580_v9 = vpop.f32.mrb[9].mxu1 }
 0xedf   : > { %1562 = vrot.lane.b32.xlu1 %v1558_v8, %s4452_s2 }
 0xf51   : > { %v1563_v10 = vpop.permute.xlu1 %1562 }
 0xf52   : > { %1565 = vst.msk [vmem:[#allocation2] sm:$0xff] %vm654_vm6, %v1563_v10 }
 0xf59   : > { %v1566_v11 = vld [vmem:[#allocation2] sm:$0xff] }
 0xf5a   : > { %1570 = vrot.lane.b32.xlu1 %v1566_v11, %s4453_s20  ;;  %1568 = vrot.lane.b32.xlu0 %v1566_v11, %s4454_s19 }
 0xfcc   : > { %v1571_v12 = vpop.permute.xlu1 %1570  ;;  %v1569_v13 = vpop.permute.xlu0 %1568 }
 0xfcd   : > { %v3798_v14 = vpack.i.bf16 %v1569_v13, %v1566_v11  ;;  %1581 = vrot.lane.b32.xlu1 %v1571_v12, %s4455_s26  ;;  %v1448_v11 = vld [vmem:[%s4412_s13 + $0x10] sm:$0xff] }
 0xfcf   : > { %3799 = vrot.lane.b32.xlu0 %v3798_v14, %s4455_s26 }
 0xfd1   : > { %1662 = vperm.xlu1 %3792, %v1450_v15  }
 0xfd3   : > { %1574 = vperm.xlu0 %3786, %v1442_v16  }
0x103f   : > { %v1582_v22 = vpop.permute.xlu1 %1581 }
0x1041   : > { %v3800_v17 = vpop.permute.xlu0 %3799 }
0x1042   : > { %v3802_v18 = vunpack.i.h.bf16 %v3800_v17  ;;  %v3801_v19 = vunpack.i.l.bf16 %v3800_v17 }
0x1044   : > { %v3725_v20 = vpack.c.bf16 %v3802_v18, %v3801_v19  ;;  %v1453_v19 = vld [vmem:[%s4413_s14 + $0x18] sm:$0xff] }
0x1046   : > { %3726 = vmatpush3.bf16.msra.mxu0 %v3725_v20  ;;  %v1445_v20 = vld [vmem:[%s4411_s12 + $0x18] sm:$0xff] }
0x1047   : > { %3585 = vmatprep.subr.mxu0 %v3852_v2 }
0x104a   : > { %3586 = vmatpush3.msra.mxu0 %v1582_v22  ;;  %v1455_v22 = vld [vmem:[%s4415_s16] sm:$0x3f] }
0x104b   : > { %3588 = vmatmul.mubr.msk.f32.vlgmr.msra.gmra.mrb[12].mxu0 %vm676_vm7, %v1438_v21  ;;  %3604 = vmatprep.subr.mxu0 %v3852_v2  ;;  %v3388_v21 = vld [vmem:[%s4409_s10 + $0x8] sm:$0xff] }
0x104c   : > { %3606 = vmatprep.mubr.msk.f32.mxu0 %vm3851_vm0, %v3852_v2 }
0x1050   : > { %v1663_v29 = vpop.permute.xlu1 %1662 }
0x1052   : > { %v1575_v23 = vpop.permute.xlu0 %1574 }
0x111e   : > { %v1655_v24 = vpop.f32.mrb[12].mxu0 }
0x111f   : > { %v1656_v25 = vadd.f32 %v1655_v24, %v1575_v23  ;;  %v3589_v26 = vpop.f32.mrb[13].mxu0 }
0x1121   : > { %v1659_v27 = vmax.f32 %v1656_v25, 0.0  ;;  %v1441_v25 = vld [vmem:[%s4410_s11 + $0x18] sm:$0xff] }
0x1123   : > { %3591 = vmatpush3.msra.mxu1 %v1659_v27 }
0x1124   : > { %3593 = vmatmul.mubr.msk.f32.vlgmr.msra.gmra.mrb[10].mxu1 %vm756_vm8, %v1446_v28  ;;  %3727 = vmatprep.subr.bf16.mxu1 %v3850_v0 }
0x1125   : > { %3601 = vmatprep.mubr.msk.f32.mxu1 %vm3851_vm0, %v3852_v2 }
0x11f7   : > { %v1734_v30 = vpop.f32.mrb[10].mxu1 }
0x11f8   : > { %v1735_v31 = vadd.f32 %v1734_v30, %v1663_v29  ;;  %v3594_v32 = vpop.f32.mrb[11].mxu1 }
0x11f9   : > { %v1449_v32 = vld [vmem:[%s4412_s13 + $0x18] sm:$0xff] }
0x11fa   : > { %v1738_v33 = vadd.f32 %v1735_v31, %v1558_v8 }
0x11fc   : > { %1740 = vrot.lane.b32.xlu0 %v1738_v33, %s4452_s2 }
0x126e   : > { %v1741_v34 = vpop.permute.xlu0 %1740 }
0x126f   : > { %1743 = vst.msk [vmem:[#allocation2] sm:$0xff] %vm654_vm6, %v1741_v34 }
0x1276   : > { %v1744_v35 = vld [vmem:[#allocation2] sm:$0xff] }
0x1277   : > { %1748 = vrot.lane.b32.xlu0 %v1744_v35, %s4456_s21  ;;  %1746 = vrot.lane.b32.xlu1 %v1744_v35, %s4453_s20 }
0x12e9   : > { %v1749_v36 = vpop.permute.xlu0 %1748  ;;  %v1747_v37 = vpop.permute.xlu1 %1746 }
0x12ea   : > { %v3803_v38 = vpack.i.bf16 %v1747_v37, %v1744_v35  ;;  %1759 = vrot.lane.b32.xlu0 %v1749_v36, %s4457_s1 }
0x12ec   : > { %3804 = vrot.lane.b32.xlu1 %v3803_v38, %s4457_s1  ;;  %v1454_v38 = vld [vmem:[%s4414_s15] sm:$0x3f] }
0x12ee   : > { %1840 = vperm.xlu0 %3786, %v1451_v39  }
0x12f0   : > { %1752 = vperm.xlu1 %3792, %v1443_v40  }
0x135c   : > { %v1760_v46 = vpop.permute.xlu0 %1759 }
0x135e   : > { %v3805_v41 = vpop.permute.xlu1 %3804 }
0x135f   : > { %v3807_v42 = vunpack.i.h.bf16 %v3805_v41  ;;  %v3806_v43 = vunpack.i.l.bf16 %v3805_v41 }
0x1361   : > { %v3728_v44 = vpack.c.bf16 %v3807_v42, %v3806_v43 }
0x1363   : > { %3729 = vmatpush3.bf16.msra.mxu1 %v3728_v44 }
0x1364   : > { %3599 = vmatprep.subr.mxu1 %v3852_v2 }
0x1367   : > { %3600 = vmatpush3.msra.mxu1 %v1760_v46 }
0x1368   : > { %3602 = vmatmul.mubr.msk.f32.vlgmr.msra.gmra.mrb[12].mxu1 %vm676_vm7, %v1439_v45  ;;  %3618 = vmatprep.subr.mxu1 %v3852_v2 }
0x1369   : > { %3620 = vmatprep.mubr.msk.f32.mxu1 %vm3851_vm0, %v3852_v2 }
0x136d   : > { %v1841_v53 = vpop.permute.xlu0 %1840 }
0x136f   : > { %v1753_v47 = vpop.permute.xlu1 %1752 }
0x143b   : > { %v1833_v48 = vpop.f32.mrb[12].mxu1 }
0x143c   : > { %v1834_v49 = vadd.f32 %v1833_v48, %v1753_v47  ;;  %v3603_v50 = vpop.f32.mrb[13].mxu1 }
0x143e   : > { %v1837_v51 = vmax.f32 %v1834_v49, 0.0 }
0x1440   : > { %3605 = vmatpush3.msra.mxu0 %v1837_v51 }
0x1441   : > { %3607 = vmatmul.mubr.msk.f32.vlgmr.msra.gmra.mrb[14].mxu0 %vm756_vm8, %v1447_v52  ;;  %3730 = vmatprep.subr.bf16.mxu0 %v3850_v0 }
0x1442   : > { %3615 = vmatprep.mubr.msk.f32.mxu0 %vm3851_vm0, %v3852_v2 }
0x1514   : > { %v1912_v54 = vpop.f32.mrb[14].mxu0 }
0x1515   : > { %v1913_v55 = vadd.f32 %v1912_v54, %v1841_v53  ;;  %v3608_v56 = vpop.f32.mrb[15].mxu0 }
0x1517   : > { %v1916_v57 = vadd.f32 %v1913_v55, %v1738_v33 }
0x1519   : > { %1918 = vrot.lane.b32.xlu1 %v1916_v57, %s4452_s2 }
0x158b   : > { %v1919_v58 = vpop.permute.xlu1 %1918 }
0x158c   : > { %1921 = vst.msk [vmem:[#allocation2] sm:$0xff] %vm654_vm6, %v1919_v58 }
0x1593   : > { %v1922_v59 = vld [vmem:[#allocation2] sm:$0xff] }
0x1594   : > { %1926 = vrot.lane.b32.xlu1 %v1922_v59, %s4458_s3  ;;  %1924 = vrot.lane.b32.xlu0 %v1922_v59, %s4456_s21 }
0x1606   : > { %v1927_v60 = vpop.permute.xlu1 %1926  ;;  %v1925_v61 = vpop.permute.xlu0 %1924 }
0x1607   : > { %1935 = vrot.lane.b32.xlu1 %v1927_v60, %s4456_s21  ;;  %1933 = vrot.lane.b32.xlu0 %v1925_v61, %s4456_s21 }
0x160b   : > { %2016 = vperm.xlu1 %3792, %v1452_v62   ;;  %1930 = vperm.xlu0 %3786, %v1444_v63  }
0x1679   : > { %v1934_v1 = vpop.permute.xlu0 %1933  ;;  %v1936_v5 = vpop.permute.xlu1 %1935 }
0x167a   : > { %v3731_v3 = vpack.c.bf16 %v1934_v1, %v1925_v61 }
0x167c   : > { %3732 = vmatpush3.bf16.msra.mxu0 %v3731_v3  ;;  %v3387_v3 = vld [vmem:[%s4408_s9 + $0x8] sm:$0xff] }
0x167d   : > { %3613 = vmatprep.subr.mxu0 %v3852_v2 }
0x1680   : > { %3614 = vmatpush3.msra.mxu0 %v1936_v5 }
0x1681   : > { %3616 = vmatmul.mubr.msk.f32.vlgmr.msra.gmra.mrb[16].mxu0 %vm676_vm7, %v1440_v4  ;;  %3632 = vmatprep.subr.mxu0 %v3852_v2 }
0x1682   : > { %3634 = vmatprep.mubr.msk.f32.mxu0 %vm3851_vm0, %v3852_v2 }
0x168a   : > { %v1931_v6 = vpop.permute.xlu0 %1930  ;;  %v2017_v12 = vpop.permute.xlu1 %2016 }
0x1754   : > { %v2009_v7 = vpop.f32.mrb[16].mxu0 }
0x1755   : > { %v2010_v8 = vadd.f32 %v2009_v7, %v1931_v6  ;;  %v3617_v9 = vpop.f32.mrb[17].mxu0 }
0x1757   : > { %v2013_v10 = vmax.f32 %v2010_v8, 0.0 }
0x1759   : > { %3619 = vmatpush3.msra.mxu1 %v2013_v10 }
0x175a   : > { %3621 = vmatmul.mubr.msk.f32.vlgmr.msra.gmra.mrb[14].mxu1 %vm756_vm8, %v1448_v11  ;;  %3733 = vmatprep.subr.bf16.mxu1 %v3850_v0 }
0x175b   : > { %3629 = vmatprep.mubr.msk.f32.mxu1 %vm3851_vm0, %v3852_v2 }
0x182d   : > { %v2088_v13 = vpop.f32.mrb[14].mxu1 }
0x182e   : > { %v2089_v14 = vadd.f32 %v2088_v13, %v2017_v12  ;;  %v3622_v15 = vpop.f32.mrb[15].mxu1  ;;  %v3401_v13 = vld [vmem:[%s4413_s14 + $0x20] sm:$0xff] }
0x1830   : > { %v2092_v16 = vadd.f32 %v2089_v14, %v1916_v57  ;;  %v3393_v14 = vld [vmem:[%s4411_s12 + $0x20] sm:$0xff] }
0x1832   : > { %2094 = vrot.lane.b32.xlu0 %v2092_v16, %s4452_s2 }
0x18a4   : > { %v2095_v17 = vpop.permute.xlu0 %2094 }
0x18a5   : > { %2097 = vst.msk [vmem:[#allocation2] sm:$0xff] %vm654_vm6, %v2095_v17 }
0x18ac   : > { %v2098_v18 = vld [vmem:[#allocation2] sm:$0xff] }
0x18ad   : > { %2103 = vrot.lane.b32.xlu0 %v2098_v18, %s4459_s5  ;;  %2100 = vrot.lane.b32.xlu1 %v2098_v18, %s4458_s3 }
0x18b1   : > { %2187 = vperm.xlu0 %3786, %v1453_v19   ;;  %2108 = vperm.xlu1 %3792, %v1445_v20   ;;  %v3389_v19 = vld [vmem:[%s4410_s11 + $0x20] sm:$0xff] }
0x18b5   : > { %2396 = vperm.xlu0 %3786, %v3388_v21   ;;  %2266 = vperm.xlu1 %3792, %v1455_v22  }
0x191f   : > { %v2101_v23 = vpop.permute.xlu1 %2100  ;;  %v2104_v26 = vpop.permute.xlu0 %2103 }
0x1920   : > { %v3734_v24 = vpack.c.bf16 %v2101_v23, %v2098_v18 }
0x1922   : > { %3735 = vmatpush3.bf16.msra.mxu1 %v3734_v24 }
0x1923   : > { %3627 = vmatprep.subr.mxu1 %v3852_v2 }
0x1926   : > { %3628 = vmatpush3.msra.mxu1 %v2104_v26  ;;  %v3397_v26 = vld [vmem:[%s4412_s13 + $0x20] sm:$0xff] }
0x1927   : > { %3630 = vmatmul.mubr.msk.f32.vlgmr.msra.gmra.mrb[16].mxu1 %vm676_vm7, %v1441_v25  ;;  %3642 = vmatprep.subr.mxu1 %v3852_v2 }
0x1928   : > { %3644 = vmatprep.mubr.msk.f32.mxu1 %vm3851_vm0, %v3852_v2 }
0x1930   : > { %v2109_v27 = vpop.permute.xlu1 %2108  ;;  %v2188_v33 = vpop.permute.xlu0 %2187 }
0x1934   : > { %v2267_v39 = vpop.permute.xlu1 %2266  ;;  %v2397_v4 = vpop.permute.xlu0 %2396 }
0x19fa   : > { %v2180_v28 = vpop.f32.mrb[16].mxu1 }
0x19fb   : > { %v2181_v29 = vadd.f32 %v2180_v28, %v2109_v27  ;;  %v3631_v30 = vpop.f32.mrb[17].mxu1 }
0x19fd   : > { %v2184_v31 = vmax.f32 %v2181_v29, 0.0 }
0x19ff   : > { %3633 = vmatpush3.msra.mxu0 %v2184_v31 }
0x1a00   : > { %3635 = vmatmul.mubr.msk.f32.vlgmr.msra.gmra.mrb[18].mxu0 %vm756_vm8, %v1449_v32  ;;  %3637 = vmatprep.subr.mxu0 %v3852_v2 }
0x1a01   : > { %3639 = vmatprep.mubr.msk.f32.mxu0 %vm3851_vm0, %v3852_v2 }
0x1ad3   : > { %v2259_v34 = vpop.f32.mrb[18].mxu0 }
0x1ad4   : > { %v2260_v35 = vadd.f32 %v2259_v34, %v2188_v33  ;;  %v3636_v36 = vpop.f32.mrb[19].mxu0 }
0x1ad6   : > { %v2263_v37 = vadd.f32 %v2260_v35, %v2092_v16 }
0x1ad8   : > { %3638 = vmatpush3.msra.mxu0 %v2263_v37  ;;  %v3402_v37 = vld [vmem:[%s4413_s14 + $0x28] sm:$0xff] }
0x1ad9   : > { %3640 = vmatmul.mubr.msk.f32.vlgmr.msra.gmra.mrb[20].mxu0 %vm756_vm8, %v1454_v38  ;;  %3736 = vmatprep.subr.bf16.mxu0 %v3850_v0  ;;  %v3394_v38 = vld [vmem:[%s4411_s12 + $0x28] sm:$0xff] }
0x1ada   : > { %3653 = vmatprep.mubr.msk.f32.mxu0 %vm3851_vm0, %v3852_v2 }
0x1bac   : > { %v2338_v40 = vpop.f32.mrb[20].mxu0 }
0x1bad   : > { %v2339_v41 = vadd.f32 %v2338_v40, %v2267_v39  ;;  %v3641_v42 = vpop.f32.mrb[21].mxu0 }
0x1baf   : > { %3386 = vst.msk [vmem:[%s4123_s0 + $0x8] sm:$0x3f] %vm1434_vm9, %v2339_v41  ;;  %v2372_v43 = vsel %vm1434_vm9, %v2339_v41, -inf }
0x1bb0   : > { %v2373_v44 = vrot.slane %v2372_v43, 4 }
0x1bb2   : > { %v2374_v45 = vmax.f32 %v2372_v43, %v2373_v44  ;;  %v3390_v43 = vld [vmem:[%s4410_s11 + $0x28] sm:$0xff] }
0x1bb4   : > { %v2375_v46 = vrot.slane %v2374_v45, 2 }
0x1bb6   : > { %v2376_v47 = vmax.f32 %v2374_v45, %v2375_v46 }
0x1bb8   : > { %v2377_v48 = vrot.slane %v2376_v47, 1 }
0x1bba   : > { %v2378_v49 = vmax.f32 %v2376_v47, %v2377_v48 }
0x1bbc   : > { %v2379_v50 = vsub.f32 %v2339_v41, %v2378_v49 }
0x1bbe   : > { %v2380_v51 = vmul.f32 1.442695, %v2379_v50  ;;  %v3398_v50 = vld [vmem:[%s4412_s13 + $0x28] sm:$0xff] }
0x1bc0   : > { %3822 = vpow2.f32 %v2380_v51 }
0x1bca   : > { %v3823_v52 = vpop.eup %3822 }
0x1bcb   : > { %v2382_v53 = vsel %vm1434_vm9, %v3823_v52, 0.0 }
0x1bcc   : > { %v2383_v54 = vrot.slane %v2382_v53, 4 }
0x1bce   : > { %v2384_v55 = vadd.f32 %v2383_v54, %v2382_v53 }
0x1bd0   : > { %v2385_v56 = vrot.slane %v2384_v55, 2 }
0x1bd2   : > { %v2386_v57 = vadd.f32 %v2385_v56, %v2384_v55 }
0x1bd4   : > { %v2387_v58 = vrot.slane %v2386_v57, 1 }
0x1bd6   : > { %v2388_v59 = vadd.f32 %v2387_v58, %v2386_v57 }
0x1bd8   : > { %3824 = vrcp.f32 %v2388_v59 }
0x1be2   : > { %v3825_v60 = vpop.eup %3824 }
0x1be3   : > { %v2390_v61 = vmul.f32 %v3825_v60, %v2388_v59 }
0x1be5   : > { %v2391_v62 = vsub.f32 2.0, %v2390_v61  ;;  %v3395_v61 = vld [vmem:[%s4411_s12 + $0x30] sm:$0xff] }
0x1be7   : > { %v2392_v63 = vmul.f32 %v3825_v60, %v2391_v62  ;;  %v3403_v60 = vld [vmem:[%s4413_s14 + $0x30] sm:$0xff] }
0x1be9   : > { %v2393_v1 = vmul.f32 %v3823_v52, %v2392_v63 }
0x1beb   : > { %3643 = vmatpush3.msk.msra.mxu1 %vm1487_vm10, %v2393_v1  ;;  %v3391_v1 = vld [vmem:[%s4410_s11 + $0x30] sm:$0xff] }
0x1bec   : > { %3645 = vmatmul.mubr.msk.f32.vlgmr.msra.gmra.mrb[18].mxu1 %vm1483_vm11, %v3387_v3  ;;  %3656 = vmatprep.subr.mxu1 %v3852_v2 }
0x1bed   : > { %3658 = vmatprep.mubr.msk.f32.mxu1 %vm3851_vm0, %v3852_v2 }
0x1cbf   : > { %v2471_v5 = vpop.f32.mrb[18].mxu1 }
0x1cc0   : > { %v2472_v6 = vadd.f32 %v2471_v5, %v2397_v4  ;;  %v3646_v7 = vpop.f32.mrb[19].mxu1 }
0x1cc2   : > { %2476 = vrot.lane.b32.xlu1 %v2472_v6, %s4452_s2 }
0x1d34   : > { %v2477_v8 = vpop.permute.xlu1 %2476 }
0x1d35   : > { %2479 = vst.msk [vmem:[#allocation2] sm:$0xff] %vm654_vm6, %v2477_v8 }
0x1d3c   : > { %v2480_v9 = vld [vmem:[#allocation2] sm:$0xff] }
0x1d3d   : > { %2484 = vrot.lane.b32.xlu1 %v2480_v9, %s4453_s20  ;;  %2482 = vrot.lane.b32.xlu0 %v2480_v9, %s4454_s19 }
0x1daf   : > { %v2485_v10 = vpop.permute.xlu1 %2484  ;;  %v2483_v11 = vpop.permute.xlu0 %2482 }
0x1db0   : > { %v3808_v12 = vpack.i.bf16 %v2483_v11, %v2480_v9  ;;  %2495 = vrot.lane.b32.xlu1 %v2485_v10, %s4455_s26  ;;  %v3399_v9 = vld [vmem:[%s4412_s13 + $0x30] sm:$0xff] }
0x1db2   : > { %3809 = vrot.lane.b32.xlu0 %v3808_v12, %s4455_s26 }
0x1db4   : > { %2576 = vperm.xlu1 %3792, %v3401_v13  }
0x1db6   : > { %2488 = vperm.xlu0 %3786, %v3393_v14  }
0x1e22   : > { %v2496_v20 = vpop.permute.xlu1 %2495 }
0x1e24   : > { %v3810_v15 = vpop.permute.xlu0 %3809 }
0x1e25   : > { %v3812_v16 = vunpack.i.h.bf16 %v3810_v15  ;;  %v3811_v17 = vunpack.i.l.bf16 %v3810_v15 }
0x1e27   : > { %v3737_v18 = vpack.c.bf16 %v3812_v16, %v3811_v17  ;;  %v3396_v17 = vld [vmem:[%s4411_s12 + $0x38] sm:$0xff] }
0x1e29   : > { %3738 = vmatpush3.bf16.msra.mxu0 %v3737_v18  ;;  %v3406_v18 = vld [vmem:[%s4415_s16 + $0x8] sm:$0x3f] }
0x1e2a   : > { %3651 = vmatprep.subr.mxu0 %v3852_v2 }
0x1e2d   : > { %3652 = vmatpush3.msra.mxu0 %v2496_v20 }
0x1e2e   : > { %3654 = vmatmul.mubr.msk.f32.vlgmr.msra.gmra.mrb[22].mxu0 %vm676_vm7, %v3389_v19  ;;  %3670 = vmatprep.subr.mxu0 %v3852_v2 }
0x1e2f   : > { %3672 = vmatprep.mubr.msk.f32.mxu0 %vm3851_vm0, %v3852_v2 }
0x1e33   : > { %v2577_v27 = vpop.permute.xlu1 %2576 }
0x1e35   : > { %v2489_v21 = vpop.permute.xlu0 %2488 }
0x1f01   : > { %v2569_v22 = vpop.f32.mrb[22].mxu0 }
0x1f02   : > { %v2570_v23 = vadd.f32 %v2569_v22, %v2489_v21  ;;  %v3655_v24 = vpop.f32.mrb[23].mxu0  ;;  %v3392_v21 = vld [vmem:[%s4410_s11 + $0x38] sm:$0xff] }
0x1f04   : > { %v2573_v25 = vmax.f32 %v2570_v23, 0.0 }
0x1f06   : > { %3657 = vmatpush3.msra.mxu1 %v2573_v25 }
0x1f07   : > { %3659 = vmatmul.mubr.msk.f32.vlgmr.msra.gmra.mrb[20].mxu1 %vm756_vm8, %v3397_v26  ;;  %3739 = vmatprep.subr.bf16.mxu1 %v3850_v0 }
0x1f08   : > { %3667 = vmatprep.mubr.msk.f32.mxu1 %vm3851_vm0, %v3852_v2 }
0x1fda   : > { %v2648_v28 = vpop.f32.mrb[20].mxu1 }
0x1fdb   : > { %v2649_v29 = vadd.f32 %v2648_v28, %v2577_v27  ;;  %v3660_v30 = vpop.f32.mrb[21].mxu1  ;;  %v3400_v28 = vld [vmem:[%s4412_s13 + $0x38] sm:$0xff] }
0x1fdd   : > { %v2652_v31 = vadd.f32 %v2649_v29, %v2472_v6 }
0x1fdf   : > { %2654 = vrot.lane.b32.xlu0 %v2652_v31, %s4452_s2 }
0x2051   : > { %v2655_v32 = vpop.permute.xlu0 %2654 }
0x2052   : > { %2657 = vst.msk [vmem:[#allocation2] sm:$0xff] %vm654_vm6, %v2655_v32 }
0x2059   : > { %v2658_v33 = vld [vmem:[#allocation2] sm:$0xff] }
0x205a   : > { %2662 = vrot.lane.b32.xlu0 %v2658_v33, %s4456_s21  ;;  %2660 = vrot.lane.b32.xlu1 %v2658_v33, %s4453_s20 }
0x20cc   : > { %v2663_v34 = vpop.permute.xlu0 %2662  ;;  %v2661_v35 = vpop.permute.xlu1 %2660 }
0x20cd   : > { %v3813_v36 = vpack.i.bf16 %v2661_v35, %v2658_v33  ;;  %2673 = vrot.lane.b32.xlu0 %v2663_v34, %s4457_s1  ;;  %v3405_v34 = vld [vmem:[%s4414_s15 + $0x8] sm:$0x3f] }
0x20cf   : > { %3814 = vrot.lane.b32.xlu1 %v3813_v36, %s4457_s1 }
0x20d1   : > { %2754 = vperm.xlu0 %3786, %v3402_v37  }
0x20d3   : > { %2666 = vperm.xlu1 %3792, %v3394_v38  }
0x213f   : > { %v2674_v44 = vpop.permute.xlu0 %2673 }
0x2141   : > { %v3815_v39 = vpop.permute.xlu1 %3814 }
0x2142   : > { %v3817_v40 = vunpack.i.h.bf16 %v3815_v39  ;;  %v3816_v41 = vunpack.i.l.bf16 %v3815_v39  ;;  %v3300_v39 = vld [vmem:[%s4123_s0 + $0x8] sm:$0xff] (%p3978_p4) }
0x2143   : > { %3301 = vst [vmem:[%s3266_s29 + $0x10] sm:$0xff] (%p3978_p4), %v3300_v39 }
0x2144   : > { %v3740_v42 = vpack.c.bf16 %v3817_v40, %v3816_v41 }
0x2146   : > { %3741 = vmatpush3.bf16.msra.mxu1 %v3740_v42 }
0x2147   : > { %3665 = vmatprep.subr.mxu1 %v3852_v2 }
0x214a   : > { %3666 = vmatpush3.msra.mxu1 %v2674_v44 }
0x214b   : > { %3668 = vmatmul.mubr.msk.f32.vlgmr.msra.gmra.mrb[22].mxu1 %vm676_vm7, %v3390_v43  ;;  %3684 = vmatprep.subr.mxu1 %v3852_v2 }
0x214c   : > { %3686 = vmatprep.mubr.msk.f32.mxu1 %vm3851_vm0, %v3852_v2 }
0x2150   : > { %v2755_v51 = vpop.permute.xlu0 %2754 }
0x2152   : > { %v2667_v45 = vpop.permute.xlu1 %2666 }
0x221e   : > { %v2747_v46 = vpop.f32.mrb[22].mxu1 }
0x221f   : > { %v2748_v47 = vadd.f32 %v2747_v46, %v2667_v45  ;;  %v3669_v48 = vpop.f32.mrb[23].mxu1 }
0x2221   : > { %v2751_v49 = vmax.f32 %v2748_v47, 0.0 }
0x2223   : > { %3671 = vmatpush3.msra.mxu0 %v2751_v49 }
0x2224   : > { %3673 = vmatmul.mubr.msk.f32.vlgmr.msra.gmra.mrb[24].mxu0 %vm756_vm8, %v3398_v50  ;;  %3742 = vmatprep.subr.bf16.mxu0 %v3850_v0 }
0x2225   : > { %3681 = vmatprep.mubr.msk.f32.mxu0 %vm3851_vm0, %v3852_v2 }
0x22f7   : > { %v2826_v52 = vpop.f32.mrb[24].mxu0 }
0x22f8   : > { %v2827_v53 = vadd.f32 %v2826_v52, %v2755_v51  ;;  %v3674_v54 = vpop.f32.mrb[25].mxu0 }
0x22fa   : > { %v2830_v55 = vadd.f32 %v2827_v53, %v2652_v31 }
0x22fc   : > { %2832 = vrot.lane.b32.xlu1 %v2830_v55, %s4452_s2 }
0x236e   : > { %v2833_v56 = vpop.permute.xlu1 %2832 }
0x236f   : > { %2835 = vst.msk [vmem:[#allocation2] sm:$0xff] %vm654_vm6, %v2833_v56 }
0x2376   : > { %v2836_v57 = vld [vmem:[#allocation2] sm:$0xff] }
0x2377   : > { %2840 = vrot.lane.b32.xlu1 %v2836_v57, %s4458_s3  ;;  %2838 = vrot.lane.b32.xlu0 %v2836_v57, %s4456_s21 }
0x23e9   : > { %v2841_v58 = vpop.permute.xlu1 %2840  ;;  %v2839_v59 = vpop.permute.xlu0 %2838 }
0x23ea   : > { %2849 = vrot.lane.b32.xlu1 %v2841_v58, %s4456_s21  ;;  %2847 = vrot.lane.b32.xlu0 %v2839_v59, %s4456_s21 }
0x23ee   : > { %2930 = vperm.xlu1 %3792, %v3403_v60   ;;  %2844 = vperm.xlu0 %3786, %v3395_v61  }
0x245c   : > { %v2848_v62 = vpop.permute.xlu0 %2847  ;;  %v2850_v3 = vpop.permute.xlu1 %2849 }
0x245d   : > { %v3743_v63 = vpack.c.bf16 %v2848_v62, %v2839_v59 }
0x245f   : > { %3744 = vmatpush3.bf16.msra.mxu0 %v3743_v63 }
0x2460   : > { %3679 = vmatprep.subr.mxu0 %v3852_v2 }
0x2463   : > { %3680 = vmatpush3.msra.mxu0 %v2850_v3 }
0x2464   : > { %3682 = vmatmul.mubr.msk.f32.vlgmr.msra.gmra.mrb[26].mxu0 %vm676_vm7, %v3391_v1  ;;  %3698 = vmatprep.subr.mxu0 %v3852_v2 }
0x2465   : > { %3700 = vmatprep.mubr.msk.f32.mxu0 %vm3851_vm0, %v3852_v2 }
0x246d   : > { %v2845_v4 = vpop.permute.xlu0 %2844  ;;  %v2931_v10 = vpop.permute.xlu1 %2930 }
0x2537   : > { %v2923_v5 = vpop.f32.mrb[26].mxu0 }
0x2538   : > { %v2924_v6 = vadd.f32 %v2923_v5, %v2845_v4  ;;  %v3683_v7 = vpop.f32.mrb[27].mxu0 }
0x253a   : > { %v2927_v8 = vmax.f32 %v2924_v6, 0.0 }
0x253c   : > { %3685 = vmatpush3.msra.mxu1 %v2927_v8 }
0x253d   : > { %3687 = vmatmul.mubr.msk.f32.vlgmr.msra.gmra.mrb[24].mxu1 %vm756_vm8, %v3399_v9  ;;  %3745 = vmatprep.subr.bf16.mxu1 %v3850_v0  ;;  %v3404_v0 = vld [vmem:[%s4413_s14 + $0x38] sm:$0xff] }
0x253e   : > { %3695 = vmatprep.mubr.msk.f32.mxu1 %vm3851_vm0, %v3852_v2 }
0x2610   : > { %v3002_v11 = vpop.f32.mrb[24].mxu1 }
0x2611   : > { %v3003_v12 = vadd.f32 %v3002_v11, %v2931_v10  ;;  %v3688_v13 = vpop.f32.mrb[25].mxu1 }
0x2613   : > { %v3006_v14 = vadd.f32 %v3003_v12, %v2830_v55 }
0x2615   : > { %3008 = vrot.lane.b32.xlu0 %v3006_v14, %s4452_s2 }
0x2687   : > { %v3009_v15 = vpop.permute.xlu0 %3008 }
0x2688   : > { %3011 = vst.msk [vmem:[#allocation2] sm:$0xff] %vm654_vm6, %v3009_v15 }
0x268f   : > { %v3012_v16 = vld [vmem:[#allocation2] sm:$0xff] }
0x2690   : > { %3017 = vrot.lane.b32.xlu0 %v3012_v16, %s4459_s5  ;;  %3014 = vrot.lane.b32.xlu1 %v3012_v16, %s4458_s3 }
0x2694   : > { %3101 = vperm.xlu0 %3786, %v3404_v0   ;;  %3022 = vperm.xlu1 %3792, %v3396_v17  }
0x2698   : > { %3180 = vperm.xlu1 %3792, %v3406_v18  }
0x2702   : > { %v3015_v19 = vpop.permute.xlu1 %3014  ;;  %v3018_v22 = vpop.permute.xlu0 %3017 }
0x2703   : > { %v3746_v20 = vpack.c.bf16 %v3015_v19, %v3012_v16 }
0x2705   : > { %3747 = vmatpush3.bf16.msra.mxu1 %v3746_v20 }
0x2706   : > { %3693 = vmatprep.subr.mxu1 %v3852_v2 }
0x2709   : > { %3694 = vmatpush3.msra.mxu1 %v3018_v22 }
0x270a   : > { %3696 = vmatmul.mubr.msk.f32.vlgmr.msra.gmra.mrb[26].mxu1 %vm676_vm7, %v3392_v21 }
0x2713   : > { %v3023_v23 = vpop.permute.xlu1 %3022  ;;  %v3102_v29 = vpop.permute.xlu0 %3101 }
0x2717   : > { %v3181_v35 = vpop.permute.xlu1 %3180 }
0x27dd   : > { %v3094_v24 = vpop.f32.mrb[26].mxu1 }
0x27de   : > { %v3095_v25 = vadd.f32 %v3094_v24, %v3023_v23  ;;  %v3697_v26 = vpop.f32.mrb[27].mxu1 }
0x27e0   : > { %v3098_v27 = vmax.f32 %v3095_v25, 0.0 }
0x27e2   : > { %3699 = vmatpush3.msra.mxu0 %v3098_v27 }
0x27e3   : > { %3701 = vmatmul.mubr.msk.f32.vlgmr.msra.gmra.mrb[28].mxu0 %vm756_vm8, %v3400_v28  ;;  %3703 = vmatprep.subr.mxu0 %v3852_v2 }
0x27e4   : > { %3705 = vmatprep.mubr.msk.f32.mxu0 %vm3851_vm0, %v3852_v2  ;;  %v3298_v2 = vld [vmem:[%s4123_s0] sm:$0xff] (%p3978_p4) }
0x27e5   : > { %3299 = vst [vmem:[%s3266_s29] sm:$0xff] (%p3978_p4), %v3298_v2 }
0x28b6   : > { %v3173_v30 = vpop.f32.mrb[28].mxu0 }
0x28b7   : > { %v3174_v31 = vadd.f32 %v3173_v30, %v3102_v29  ;;  %v3702_v32 = vpop.f32.mrb[29].mxu0 }
0x28b9   : > { %v3177_v33 = vadd.f32 %v3174_v31, %v3006_v14 }
0x28bb   : > { %3704 = vmatpush3.msra.mxu0 %v3177_v33 }
0x28bc   : > { %3706 = vmatmul.mubr.msk.f32.vlgmr.msra.gmra.mrb[30].mxu0 %vm756_vm8, %v3405_v34 }
0x298c   : > { %3264 = sbr.rel (!%p3978_p4) target bundleno = 10651 (0x299b), region = 92 }
0x298f   : > { %v3252_v36 = vpop.f32.mrb[30].mxu0 }
0x2990   : > { %v3253_v37 = vadd.f32 %v3252_v36, %v3181_v35  ;;  %v3707_v38 = vpop.f32.mrb[31].mxu0 }
0x2992   : > { %3418 = vst.msk [vmem:[%s4123_s0 + $0x10] sm:$0x3f] %vm1434_vm9, %v3253_v37 }
0x2999   : > { %v3302_v40 = vld [vmem:[%s4123_s0 + $0x10] sm:$0xff] }
0x299a   : > { %3303 = vst [vmem:[%s3266_s29 + $0x20] sm:$0xff] %v3302_v40 }
0x299b PF: > { %p24_p8 = scmp.ge.s32.totalorder %s3968_s28, 4   ;;  %s4460_s24 = smov %s3844_s25 }
0x299c   : > { %s4461_s25 = smov %s3976_s30  ;;  %s4462_s26 = smov %s3968_s28 }
0x299d   :  { %26 = sbr.rel (!%p24_p8) target bundleno = 12 (0xc), region = 166 }

</bundles_post_ra>
